<compile_context>
chip_gen: v7x
topology: tpu7x:2x2x1
jax: 0.10.0
libtpu: 0.0.40
codegen_flags: <defaults>
</compile_context>

<pallas_src>
import functools

import jax
import jax.numpy as jnp
import numpy as np
from jax.experimental import pallas as pl
from jax.experimental.pallas import tpu as pltpu

LANE_PAD = 128          # lane-dense readout width (n_classes zero-padded to 128 lanes)
DEFAULT_TILE_N = 512    # node rows per grid step (multiple of 128; measured sweet spot)
_HI = jax.lax.Precision.HIGHEST


def _round_up(n, m):
    return (n + m - 1) // m * m


def _vmem_capacity_bytes():
    try:
        return int(pltpu.get_tpu_info().vmem_capacity_bytes)
    except Exception:
        return 64 * 1024 * 1024            # v7x per-TensorCore floor


def _pick_tile_n(num_nodes, in_dim, vmem_cap):
    """Full-resident single step for small inputs, else 512-row streaming tiles."""
    n128 = _round_up(max(num_nodes, 1), 128)   # 128-multiple keeps v5e's 4x128 MXU fed
    x_bytes = 2 * n128 * in_dim * 2            # double-buffered bf16 x slab
    if n128 <= 1024 and x_bytes <= vmem_cap // 8:
        return n128                            # grid=(1,): no per-step pipeline overhead
    return DEFAULT_TILE_N


def _segment_metadata(batch_np, num_nodes, num_graphs, tile_n, n_pad):
    """Per-tile SMEM control data for the in-kernel segment max.

    Returns:
      g_base [T] int32      : first (8-aligned) graph slot touched by tile t.
      seg    [T, 2*S] int32 : local [lo, hi) node-row range of graph (g_base[t]+s)
                              inside tile t, clipped to [0, tile_n] (lo==hi => empty).
      ng_slots (S), g_scratch : static slot count / hg row count (multiples of 8).
    """
    num_tiles = n_pad // tile_n
    gstart = np.searchsorted(batch_np, np.arange(num_graphs)).astype(np.int64)
    gend = np.concatenate([gstart[1:], np.array([num_nodes], np.int64)])

    g_first = np.empty(num_tiles, np.int64)
    g_last = np.empty(num_tiles, np.int64)
    for t in range(num_tiles):
        lo = min(t * tile_n, num_nodes - 1)
        hi = min((t + 1) * tile_n, num_nodes)
        g_first[t] = batch_np[lo]
        g_last[t] = batch_np[hi - 1]
    g_base = (g_first // 8) * 8
    ng_slots = max(8, _round_up(int(np.max(g_last - g_base)) + 1, 8))

    seg = np.zeros((num_tiles, 2 * ng_slots), np.int32)
    for t in range(num_tiles):
        for s in range(ng_slots):
            gid = int(g_base[t]) + s
            if gid < num_graphs:
                seg[t, 2 * s] = np.clip(gstart[gid] - t * tile_n, 0, tile_n)
                seg[t, 2 * s + 1] = np.clip(gend[gid] - t * tile_n, 0, tile_n)
            # else: slot stays [0, 0) -> empty -> contributes nothing
    g_scratch = _round_up(max(num_graphs, int(np.max(g_base)) + ng_slots), 8)
    return g_base.astype(np.int32), seg, ng_slots, g_scratch


def _cnnnet2_kernel(g_base_ref, seg_ref,                            # scalar prefetch (SMEM)
                    x_ref, wf_ref, bf_ref, w2_ref, b2_ref, wo_ref,  # inputs (VMEM)
                    out_ref,                                        # output (VMEM)
                    hg_ref,                                         # scratch (VMEM)
                    *, ng_slots, tile_n):
    step = pl.program_id(0)

    @pl.when(step == 0)
    def _init():
        hg_ref[...] = jnp.zeros_like(hg_ref)

    # ---- node-path MLP: 2 fused Linear layers on the MXU (bf16 in, f32 accumulate) ----
    # embedding_h and gcn_list[0] are fused offline (no nonlinearity between them).
    # Bias add / ReLU / max stay in f32 (v5e has no bf16 VPU).
    h = jnp.dot(x_ref[...], wf_ref[...], preferred_element_type=jnp.float32)
    h = jnp.maximum(h + bf_ref[...], 0.0)
    h = jnp.dot(h.astype(jnp.bfloat16), w2_ref[...], preferred_element_type=jnp.float32)
    h = jnp.maximum(h + b2_ref[...], 0.0)                  # [tile_n, H2] f32, >= 0

    # ---- segment max over the <= ng_slots graphs overlapping this node tile ----
    # Nodes are contiguous per graph, so each graph is a [lo, hi) local row range whose
    # scalar bounds live in SMEM.  The 0.0 fill is exact ONLY because h >= 0 post-ReLU
    # and hg is zero-initialised (empty slots / padded rows contribute nothing).
    row = jax.lax.broadcasted_iota(jnp.int32, (tile_n, 1), 0)
    slot = jax.lax.broadcasted_iota(jnp.int32, (ng_slots, 1), 0)
    contrib = jnp.zeros((ng_slots, h.shape[1]), jnp.float32)
    for s in range(ng_slots):                              # static, fully unrolled
        lo = seg_ref[step, 2 * s]
        hi = seg_ref[step, 2 * s + 1]
        inside = (row >= lo) & (row < hi)                  # [tile_n, 1]
        part = jnp.max(jnp.where(inside, h, 0.0), axis=0, keepdims=True)   # [1, H2]
        contrib = jnp.where(slot == s, part, contrib)      # place into slot row s

    # Running per-graph max accumulated in the persistent hg scratch; the touched row
    # window [g_base, g_base + ng_slots) is 8-aligned by construction.
    g0 = pl.multiple_of(g_base_ref[step], 8)
    hg_ref[pl.ds(g0, ng_slots), :] = jnp.maximum(hg_ref[pl.ds(g0, ng_slots), :], contrib)

    # ---- readout: ONE [G, H2] @ [H2, 128] matmul and ONE lane-dense store ----
    @pl.when(step == pl.num_programs(0) - 1)
    def _readout():
        out_ref[...] = jnp.dot(hg_ref[...].astype(jnp.bfloat16), wo_ref[...],
                               preferred_element_type=jnp.float32)


def prepare_params(params):
    """Fuse embedding_h + gcn_list[0] (no nonlinearity between them), cast MXU operands
    to bf16, zero-pad the readout weight to 128 output lanes."""
    we, be, w1, b1, w2, b2, wo = params
    wf = jnp.dot(we, w1, precision=_HI).astype(jnp.bfloat16)                    # [D, H1]
    bf = (jnp.dot(be, w1, precision=_HI) + b1).reshape(1, -1).astype(jnp.float32)
    h2, n_classes = wo.shape
    assert n_classes <= LANE_PAD
    wo_pad = jnp.zeros((h2, LANE_PAD), jnp.float32).at[:, :n_classes].set(wo)
    return (wf, bf, w2.astype(jnp.bfloat16), b2.reshape(1, -1).astype(jnp.float32),
            wo_pad.astype(jnp.bfloat16))


def cnnnet2_forward(x, batch, params, num_graphs, n_classes, *, tile_n=None):
    """x: [N, in_dim] f32; batch: [N] int32 graph ids (contiguous per graph)."""
    wf, bf, w2, b2, wo_pad = prepare_params(params)
    n, d = x.shape
    h1 = wf.shape[1]
    h2 = w2.shape[1]

    # Nodes must be packed per graph (PyG batches already are); sort if they are not.
    batch_np = np.asarray(jax.device_get(batch)).astype(np.int64)
    if np.any(np.diff(batch_np) < 0):
        order = np.argsort(batch_np, kind="stable")
        x = jnp.take(x, jnp.asarray(order), axis=0)
        batch_np = batch_np[order]

    vmem_cap = _vmem_capacity_bytes()
    if tile_n is None:
        tile_n = _pick_tile_n(n, d, vmem_cap)
    n_pad = _round_up(n, tile_n)
    num_tiles = n_pad // tile_n

    g_base, seg, ng_slots, g_scratch = _segment_metadata(
        batch_np, n, num_graphs, tile_n, n_pad)

    # Padded node rows are never covered by any segment range -> no contribution.
    x_pad = jnp.zeros((n_pad, d), jnp.bfloat16).at[:n, :].set(x.astype(jnp.bfloat16))

    # Generation-aware VMEM budget: ~48 MiB on v7x (64 MiB/TC), ~96 MiB on v5e/v6e.
    vmem_limit = int(max(16 * 2**20, min(vmem_cap * 3 // 4, 100 * 2**20)))

    kernel = functools.partial(_cnnnet2_kernel, ng_slots=ng_slots, tile_n=tile_n)
    resident = lambda i, *_: (0, 0)

    out = pl.pallas_call(
        kernel,
        out_shape=jax.ShapeDtypeStruct((g_scratch, LANE_PAD), jnp.float32),
        grid_spec=pltpu.PrefetchScalarGridSpec(
            num_scalar_prefetch=2,                       # g_base, seg -> SMEM
            grid=(num_tiles,),
            in_specs=[
                # Streamed, double-buffered x node tile.  TODO(synk): try
                # pipeline_mode=pl.Buffered(3) only if xprof shows exposed DMA.
                pl.BlockSpec((tile_n, d), lambda i, *_: (i, 0)),
                pl.BlockSpec((d, h1), resident),         # fused embedding+gcn1 weight
                pl.BlockSpec((1, h1), resident),         # fused bias
                pl.BlockSpec((h1, h2), resident),        # gcn2 weight
                pl.BlockSpec((1, h2), resident),         # gcn2 bias
                pl.BlockSpec((h2, LANE_PAD), resident),  # readout weight (lane-padded)
            ],
            out_specs=pl.BlockSpec((g_scratch, LANE_PAD), resident),
            scratch_shapes=[pltpu.VMEM((g_scratch, h2), jnp.float32)],
        ),
        compiler_params=pltpu.CompilerParams(
            # Must stay "arbitrary": hg is a shared running-max scratch and the readout
            # fires only on the last step (see header TODO for the v7x megacore plan).
            dimension_semantics=("arbitrary",),
            vmem_limit_bytes=vmem_limit,
        ),
    )(jnp.asarray(g_base), jnp.asarray(seg), x_pad, wf, bf, w2, b2, wo_pad)
    return out[:num_graphs, :n_classes]


def init_params(key, in_dim, hidden_dims, n_classes):
    """Deterministic synthetic params.  Weights stored as [in, out] (pre-transposed
    relative to torch.nn.Linear's [out, in])."""
    ks = jax.random.split(key, 7)

    def w(k, fi, fo):
        return jax.random.normal(k, (fi, fo), jnp.float32) / jnp.sqrt(fi)

    we = w(ks[0], in_dim, in_dim)
    be = jax.random.normal(ks[1], (in_dim,), jnp.float32) * 0.01
    w1 = w(ks[2], in_dim, hidden_dims[0])
    b1 = jax.random.normal(ks[3], (hidden_dims[0],), jnp.float32) * 0.01
    w2 = w(ks[4], hidden_dims[0], hidden_dims[1])
    b2 = jax.random.normal(ks[5], (hidden_dims[1],), jnp.float32) * 0.01
    wo = w(ks[6], hidden_dims[1], n_classes)        # readout_mlp has bias=False
    return (we, be, w1, b1, w2, b2, wo)


def reference_forward_matched(x, batch, params, num_graphs):
    """Pure-JAX reference mirroring the kernel numerics (fused first layer, bf16 MXU
    operands, f32 accumulation, zero-filled max pooling)."""
    we, be, w1, b1, w2, b2, wo = params
    wf = jnp.dot(we, w1, precision=_HI).astype(jnp.bfloat16)
    bf = jnp.dot(be, w1, precision=_HI) + b1
    h = jnp.dot(x.astype(jnp.bfloat16), wf, preferred_element_type=jnp.float32) + bf
    h = jnp.maximum(h, 0.0)
    h = jnp.dot(h.astype(jnp.bfloat16), w2.astype(jnp.bfloat16),
                preferred_element_type=jnp.float32) + b2
    h = jnp.maximum(h, 0.0)
    hg = jnp.stack([jnp.max(jnp.where((batch == g)[:, None], h, 0.0), axis=0)
                    for g in range(num_graphs)])
    return jnp.dot(hg.astype(jnp.bfloat16), wo.astype(jnp.bfloat16),
                   preferred_element_type=jnp.float32)


def reference_forward_f32(x, batch, params, num_graphs):
    """Original (unfused, full-f32) CNNNet2 forward -- the PyTorch semantics."""
    we, be, w1, b1, w2, b2, wo = params
    h = jnp.dot(x, we, precision=_HI) + be
    h = jnp.maximum(jnp.dot(h, w1, precision=_HI) + b1, 0.0)
    h = jnp.maximum(jnp.dot(h, w2, precision=_HI) + b2, 0.0)
    hg = jnp.stack([jnp.max(jnp.where((batch == g)[:, None], h, -jnp.inf), axis=0)
                    for g in range(num_graphs)])
    return jnp.dot(hg, wo, precision=_HI)


if __name__ == "__main__":
    # Module defaults: in_dim=128, hidden=[128, 128], n_classes=10.
    IN_DIM, HIDDEN, N_CLASSES = 128, [128, 128], 10

    key = jax.random.PRNGKey(0)
    kp, kx1, kx2 = jax.random.split(key, 3)
    params = init_params(kp, IN_DIM, HIDDEN, N_CLASSES)

    def run_case(kx, graph_sizes, tile_n):
        num_graphs = len(graph_sizes)
        n = int(sum(graph_sizes))
        x = jax.random.normal(kx, (n, IN_DIM), jnp.float32)
        batch = jnp.concatenate(
            [jnp.full((s,), g, jnp.int32) for g, s in enumerate(graph_sizes)])

        logits = cnnnet2_forward(x, batch, params, num_graphs, N_CLASSES, tile_n=tile_n)
        logits = jax.block_until_ready(logits)
        assert logits.shape == (num_graphs, N_CLASSES)

        # (1) Tight check against a reference with the kernel's exact numerics.
        ref_m = reference_forward_matched(x, batch, params, num_graphs)
        assert jnp.allclose(logits, ref_m, atol=1e-3, rtol=1e-3), (
            float(jnp.max(jnp.abs(logits - ref_m))))

        # (2) Check against the original unfused f32 PyTorch math; the tolerance
        # documents the intentional bf16-at-MXU precision (~0.5% relative / matmul).
        ref32 = reference_forward_f32(x, batch, params, num_graphs)
        err = float(jnp.max(jnp.abs(logits - ref32)))
        scale = float(jnp.max(jnp.abs(ref32)))
        assert err <= 0.05 * scale + 0.05, (err, scale)

    # Case 1: tiny batch (3 graphs, 48 nodes) -> auto tile = 128, single grid step.
    run_case(kx1, [13, 15, 20], None)
    # Case 2: 11 graphs / 448 nodes with graphs spanning tile boundaries ->
    # 4 node tiles of 128 rows; exercises the running segment max and g_base != 0.
    run_case(kx2, [37, 50, 23, 64, 41, 29, 55, 33, 47, 38, 31], 128)

    print("KERNEL_OK")
</pallas_src>

<mosaic_0001>
module attributes {stable_mosaic.version = 11 : i64} {
  func.func @_cnnnet2_kernel(%arg0: i32, %arg1: memref<1xi32, #tpu.memory_space<smem>>, %arg2: memref<1x16xi32, #tpu.memory_space<smem>>, %arg3: memref<128x128xbf16, #tpu.memory_space<vmem>>, %arg4: memref<128x128xbf16, #tpu.memory_space<vmem>>, %arg5: memref<1x128xf32, #tpu.memory_space<vmem>>, %arg6: memref<128x128xbf16, #tpu.memory_space<vmem>>, %arg7: memref<1x128xf32, #tpu.memory_space<vmem>>, %arg8: memref<128x128xbf16, #tpu.memory_space<vmem>>, %arg9: memref<8x128xf32, #tpu.memory_space<vmem>>, %arg10: memref<8x128xf32, #tpu.memory_space<vmem>>) attributes {dimension_semantics = [#tpu.dimension_semantics<arbitrary>], iteration_bounds = array<i64: 1>, scalar_prefetch = 2 : i64, scratch_operands = 1 : i64, tpu.core_type = #tpu.core_type<tc>, window_params = [{transform_indices = @transform_0, window_bounds = array<i64: 128, 128>}, {pipeline_mode = #tpu.pipeline_mode<synchronous>, transform_indices = @transform_1, window_bounds = array<i64: 128, 128>}, {pipeline_mode = #tpu.pipeline_mode<synchronous>, transform_indices = @transform_2, window_bounds = array<i64: 1, 128>}, {pipeline_mode = #tpu.pipeline_mode<synchronous>, transform_indices = @transform_3, window_bounds = array<i64: 128, 128>}, {pipeline_mode = #tpu.pipeline_mode<synchronous>, transform_indices = @transform_4, window_bounds = array<i64: 1, 128>}, {pipeline_mode = #tpu.pipeline_mode<synchronous>, transform_indices = @transform_5, window_bounds = array<i64: 128, 128>}, {pipeline_mode = #tpu.pipeline_mode<synchronous>, transform_indices = @transform_6, window_bounds = array<i64: 8, 128>}]} {
    %c0_i32 = arith.constant 0 : i32
    %0 = arith.cmpi eq, %arg0, %c0_i32 : i32
    %1 = arith.extui %0 : i1 to i32
    %c0_i32_0 = arith.constant 0 : i32
    %2 = arith.cmpi ne, %1, %c0_i32_0 : i32
    scf.if %2 {
      %cst_36 = arith.constant 0.000000e+00 : f32
      %209 = vector.broadcast %cst_36 : f32 to vector<8x128xf32>
      %c0_37 = arith.constant 0 : index
      %c0_38 = arith.constant 0 : index
      %210 = vector.load %arg10[%c0_37, %c0_38] : memref<8x128xf32, #tpu.memory_space<vmem>>, vector<8x128xf32>
      tpu.vector_store %arg10[%c0_37, %c0_38], %209 {strides = array<i32>} : memref<8x128xf32, #tpu.memory_space<vmem>>, vector<8x128xf32>,
    } else {
    }
    %c0 = arith.constant 0 : index
    %c0_1 = arith.constant 0 : index
    %3 = vector.load %arg3[%c0, %c0_1] : memref<128x128xbf16, #tpu.memory_space<vmem>>, vector<128x128xbf16>
    %c0_2 = arith.constant 0 : index
    %c0_3 = arith.constant 0 : index
    %4 = vector.load %arg4[%c0_2, %c0_3] : memref<128x128xbf16, #tpu.memory_space<vmem>>, vector<128x128xbf16>
    %cst = arith.constant dense<0.000000e+00> : vector<128x128xf32>
    %5 = tpu.matmul %3, %4, %cst {dimension_numbers = #tpu.dot_dimension_numbers<[1], [0], [0], [1], [0, 0, 1, 1], [], []>} : vector<128x128xbf16>, vector<128x128xbf16>, vector<128x128xf32> -> vector<128x128xf32>
    %c0_4 = arith.constant 0 : index
    %c0_5 = arith.constant 0 : index
    %6 = vector.load %arg5[%c0_4, %c0_5] : memref<1x128xf32, #tpu.memory_space<vmem>>, vector<1x128xf32>
    %7 = vector.broadcast %6 : vector<1x128xf32> to vector<128x128xf32>
    %8 = arith.addf %5, %7 : vector<128x128xf32>
    %cst_6 = arith.constant 0.000000e+00 : f32
    %9 = vector.broadcast %cst_6 : f32 to vector<128x128xf32>
    %10 = arith.maximumf %8, %9 : vector<128x128xf32>
    %11 = arith.truncf %10 : vector<128x128xf32> to vector<128x128xbf16>
    %c0_7 = arith.constant 0 : index
    %c0_8 = arith.constant 0 : index
    %12 = vector.load %arg6[%c0_7, %c0_8] : memref<128x128xbf16, #tpu.memory_space<vmem>>, vector<128x128xbf16>
    %cst_9 = arith.constant dense<0.000000e+00> : vector<128x128xf32>
    %13 = tpu.matmul %11, %12, %cst_9 {dimension_numbers = #tpu.dot_dimension_numbers<[1], [0], [0], [1], [0, 0, 1, 1], [], []>} : vector<128x128xbf16>, vector<128x128xbf16>, vector<128x128xf32> -> vector<128x128xf32>
    %c0_10 = arith.constant 0 : index
    %c0_11 = arith.constant 0 : index
    %14 = vector.load %arg7[%c0_10, %c0_11] : memref<1x128xf32, #tpu.memory_space<vmem>>, vector<1x128xf32>
    %15 = vector.broadcast %14 : vector<1x128xf32> to vector<128x128xf32>
    %16 = arith.addf %13, %15 : vector<128x128xf32>
    %cst_12 = arith.constant 0.000000e+00 : f32
    %17 = vector.broadcast %cst_12 : f32 to vector<128x128xf32>
    %18 = arith.maximumf %16, %17 : vector<128x128xf32>
    %19 = tpu.iota {dimensions = array<i32: 0>} : vector<128x1xi32>
    %20 = tpu.iota {dimensions = array<i32: 0>} : vector<8x1xi32>
    %cst_13 = arith.constant 0.000000e+00 : f32
    %21 = vector.broadcast %cst_13 : f32 to vector<8x128xf32>
    %22 = arith.index_cast %arg0 : i32 to index
    %c0_14 = arith.constant 0 : index
    %23 = memref.load %arg2[%22, %c0_14] : memref<1x16xi32, #tpu.memory_space<smem>>
    %24 = arith.index_cast %arg0 : i32 to index
    %c1 = arith.constant 1 : index
    %25 = memref.load %arg2[%24, %c1] : memref<1x16xi32, #tpu.memory_space<smem>>
    %26 = vector.broadcast %23 : i32 to vector<128x1xi32>
    %27 = arith.cmpi sge, %19, %26 : vector<128x1xi32>
    %28 = vector.broadcast %25 : i32 to vector<128x1xi32>
    %29 = arith.cmpi slt, %19, %28 : vector<128x1xi32>
    %30 = arith.andi %27, %29 : vector<128x1xi1>
    %cst_15 = arith.constant 0.000000e+00 : f32
    %31 = vector.shape_cast %30 : vector<128x1xi1> to vector<128x1xi1>
    %32 = vector.broadcast %31 : vector<128x1xi1> to vector<128x128xi1>
    %33 = vector.broadcast %cst_15 : f32 to vector<128x128xf32>
    %34 = arith.select %32, %18, %33 : vector<128x128xi1>, vector<128x128xf32>
    %cst_16 = arith.constant dense<0xFF800000> : vector<128xf32>
    %35 = vector.multi_reduction <maximumf>, %34, %cst_16 [0] : vector<128x128xf32> to vector<128xf32>
    %36 = vector.shape_cast %35 : vector<128xf32> to vector<1x128xf32>
    %c0_i32_17 = arith.constant 0 : i32
    %37 = vector.broadcast %c0_i32_17 : i32 to vector<8x1xi32>
    %38 = arith.cmpi eq, %20, %37 : vector<8x1xi32>
    %39 = vector.shape_cast %38 : vector<8x1xi1> to vector<8x1xi1>
    %40 = vector.broadcast %39 : vector<8x1xi1> to vector<8x128xi1>
    %41 = vector.shape_cast %36 : vector<1x128xf32> to vector<1x128xf32>
    %42 = vector.broadcast %41 : vector<1x128xf32> to vector<8x128xf32>
    %43 = arith.select %40, %42, %21 : vector<8x128xi1>, vector<8x128xf32>
    %44 = arith.index_cast %arg0 : i32 to index
    %c2 = arith.constant 2 : index
    %45 = memref.load %arg2[%44, %c2] : memref<1x16xi32, #tpu.memory_space<smem>>
    %46 = arith.index_cast %arg0 : i32 to index
    %c3 = arith.constant 3 : index
    %47 = memref.load %arg2[%46, %c3] : memref<1x16xi32, #tpu.memory_space<smem>>
    %48 = vector.broadcast %45 : i32 to vector<128x1xi32>
    %49 = arith.cmpi sge, %19, %48 : vector<128x1xi32>
    %50 = vector.broadcast %47 : i32 to vector<128x1xi32>
    %51 = arith.cmpi slt, %19, %50 : vector<128x1xi32>
    %52 = arith.andi %49, %51 : vector<128x1xi1>
    %cst_18 = arith.constant 0.000000e+00 : f32
    %53 = vector.shape_cast %52 : vector<128x1xi1> to vector<128x1xi1>
    %54 = vector.broadcast %53 : vector<128x1xi1> to vector<128x128xi1>
    %55 = vector.broadcast %cst_18 : f32 to vector<128x128xf32>
    %56 = arith.select %54, %18, %55 : vector<128x128xi1>, vector<128x128xf32>
    %cst_19 = arith.constant dense<0xFF800000> : vector<128xf32>
    %57 = vector.multi_reduction <maximumf>, %56, %cst_19 [0] : vector<128x128xf32> to vector<128xf32>
    %58 = vector.shape_cast %57 : vector<128xf32> to vector<1x128xf32>
    %c1_i32 = arith.constant 1 : i32
    %59 = vector.broadcast %c1_i32 : i32 to vector<8x1xi32>
    %60 = arith.cmpi eq, %20, %59 : vector<8x1xi32>
    %61 = vector.shape_cast %60 : vector<8x1xi1> to vector<8x1xi1>
    %62 = vector.broadcast %61 : vector<8x1xi1> to vector<8x128xi1>
    %63 = vector.shape_cast %58 : vector<1x128xf32> to vector<1x128xf32>
    %64 = vector.broadcast %63 : vector<1x128xf32> to vector<8x128xf32>
    %65 = arith.select %62, %64, %43 : vector<8x128xi1>, vector<8x128xf32>
    %66 = arith.index_cast %arg0 : i32 to index
    %c4 = arith.constant 4 : index
    %67 = memref.load %arg2[%66, %c4] : memref<1x16xi32, #tpu.memory_space<smem>>
    %68 = arith.index_cast %arg0 : i32 to index
    %c5 = arith.constant 5 : index
    %69 = memref.load %arg2[%68, %c5] : memref<1x16xi32, #tpu.memory_space<smem>>
    %70 = vector.broadcast %67 : i32 to vector<128x1xi32>
    %71 = arith.cmpi sge, %19, %70 : vector<128x1xi32>
    %72 = vector.broadcast %69 : i32 to vector<128x1xi32>
    %73 = arith.cmpi slt, %19, %72 : vector<128x1xi32>
    %74 = arith.andi %71, %73 : vector<128x1xi1>
    %cst_20 = arith.constant 0.000000e+00 : f32
    %75 = vector.shape_cast %74 : vector<128x1xi1> to vector<128x1xi1>
    %76 = vector.broadcast %75 : vector<128x1xi1> to vector<128x128xi1>
    %77 = vector.broadcast %cst_20 : f32 to vector<128x128xf32>
    %78 = arith.select %76, %18, %77 : vector<128x128xi1>, vector<128x128xf32>
    %cst_21 = arith.constant dense<0xFF800000> : vector<128xf32>
    %79 = vector.multi_reduction <maximumf>, %78, %cst_21 [0] : vector<128x128xf32> to vector<128xf32>
    %80 = vector.shape_cast %79 : vector<128xf32> to vector<1x128xf32>
    %c2_i32 = arith.constant 2 : i32
    %81 = vector.broadcast %c2_i32 : i32 to vector<8x1xi32>
    %82 = arith.cmpi eq, %20, %81 : vector<8x1xi32>
    %83 = vector.shape_cast %82 : vector<8x1xi1> to vector<8x1xi1>
    %84 = vector.broadcast %83 : vector<8x1xi1> to vector<8x128xi1>
    %85 = vector.shape_cast %80 : vector<1x128xf32> to vector<1x128xf32>
    %86 = vector.broadcast %85 : vector<1x128xf32> to vector<8x128xf32>
    %87 = arith.select %84, %86, %65 : vector<8x128xi1>, vector<8x128xf32>
    %88 = arith.index_cast %arg0 : i32 to index
    %c6 = arith.constant 6 : index
    %89 = memref.load %arg2[%88, %c6] : memref<1x16xi32, #tpu.memory_space<smem>>
    %90 = arith.index_cast %arg0 : i32 to index
    %c7 = arith.constant 7 : index
    %91 = memref.load %arg2[%90, %c7] : memref<1x16xi32, #tpu.memory_space<smem>>
    %92 = vector.broadcast %89 : i32 to vector<128x1xi32>
    %93 = arith.cmpi sge, %19, %92 : vector<128x1xi32>
    %94 = vector.broadcast %91 : i32 to vector<128x1xi32>
    %95 = arith.cmpi slt, %19, %94 : vector<128x1xi32>
    %96 = arith.andi %93, %95 : vector<128x1xi1>
    %cst_22 = arith.constant 0.000000e+00 : f32
    %97 = vector.shape_cast %96 : vector<128x1xi1> to vector<128x1xi1>
    %98 = vector.broadcast %97 : vector<128x1xi1> to vector<128x128xi1>
    %99 = vector.broadcast %cst_22 : f32 to vector<128x128xf32>
    %100 = arith.select %98, %18, %99 : vector<128x128xi1>, vector<128x128xf32>
    %cst_23 = arith.constant dense<0xFF800000> : vector<128xf32>
    %101 = vector.multi_reduction <maximumf>, %100, %cst_23 [0] : vector<128x128xf32> to vector<128xf32>
    %102 = vector.shape_cast %101 : vector<128xf32> to vector<1x128xf32>
    %c3_i32 = arith.constant 3 : i32
    %103 = vector.broadcast %c3_i32 : i32 to vector<8x1xi32>
    %104 = arith.cmpi eq, %20, %103 : vector<8x1xi32>
    %105 = vector.shape_cast %104 : vector<8x1xi1> to vector<8x1xi1>
    %106 = vector.broadcast %105 : vector<8x1xi1> to vector<8x128xi1>
    %107 = vector.shape_cast %102 : vector<1x128xf32> to vector<1x128xf32>
    %108 = vector.broadcast %107 : vector<1x128xf32> to vector<8x128xf32>
    %109 = arith.select %106, %108, %87 : vector<8x128xi1>, vector<8x128xf32>
    %110 = arith.index_cast %arg0 : i32 to index
    %c8 = arith.constant 8 : index
    %111 = memref.load %arg2[%110, %c8] : memref<1x16xi32, #tpu.memory_space<smem>>
    %112 = arith.index_cast %arg0 : i32 to index
    %c9 = arith.constant 9 : index
    %113 = memref.load %arg2[%112, %c9] : memref<1x16xi32, #tpu.memory_space<smem>>
    %114 = vector.broadcast %111 : i32 to vector<128x1xi32>
    %115 = arith.cmpi sge, %19, %114 : vector<128x1xi32>
    %116 = vector.broadcast %113 : i32 to vector<128x1xi32>
    %117 = arith.cmpi slt, %19, %116 : vector<128x1xi32>
    %118 = arith.andi %115, %117 : vector<128x1xi1>
    %cst_24 = arith.constant 0.000000e+00 : f32
    %119 = vector.shape_cast %118 : vector<128x1xi1> to vector<128x1xi1>
    %120 = vector.broadcast %119 : vector<128x1xi1> to vector<128x128xi1>
    %121 = vector.broadcast %cst_24 : f32 to vector<128x128xf32>
    %122 = arith.select %120, %18, %121 : vector<128x128xi1>, vector<128x128xf32>
    %cst_25 = arith.constant dense<0xFF800000> : vector<128xf32>
    %123 = vector.multi_reduction <maximumf>, %122, %cst_25 [0] : vector<128x128xf32> to vector<128xf32>
    %124 = vector.shape_cast %123 : vector<128xf32> to vector<1x128xf32>
    %c4_i32 = arith.constant 4 : i32
    %125 = vector.broadcast %c4_i32 : i32 to vector<8x1xi32>
    %126 = arith.cmpi eq, %20, %125 : vector<8x1xi32>
    %127 = vector.shape_cast %126 : vector<8x1xi1> to vector<8x1xi1>
    %128 = vector.broadcast %127 : vector<8x1xi1> to vector<8x128xi1>
    %129 = vector.shape_cast %124 : vector<1x128xf32> to vector<1x128xf32>
    %130 = vector.broadcast %129 : vector<1x128xf32> to vector<8x128xf32>
    %131 = arith.select %128, %130, %109 : vector<8x128xi1>, vector<8x128xf32>
    %132 = arith.index_cast %arg0 : i32 to index
    %c10 = arith.constant 10 : index
    %133 = memref.load %arg2[%132, %c10] : memref<1x16xi32, #tpu.memory_space<smem>>
    %134 = arith.index_cast %arg0 : i32 to index
    %c11 = arith.constant 11 : index
    %135 = memref.load %arg2[%134, %c11] : memref<1x16xi32, #tpu.memory_space<smem>>
    %136 = vector.broadcast %133 : i32 to vector<128x1xi32>
    %137 = arith.cmpi sge, %19, %136 : vector<128x1xi32>
    %138 = vector.broadcast %135 : i32 to vector<128x1xi32>
    %139 = arith.cmpi slt, %19, %138 : vector<128x1xi32>
    %140 = arith.andi %137, %139 : vector<128x1xi1>
    %cst_26 = arith.constant 0.000000e+00 : f32
    %141 = vector.shape_cast %140 : vector<128x1xi1> to vector<128x1xi1>
    %142 = vector.broadcast %141 : vector<128x1xi1> to vector<128x128xi1>
    %143 = vector.broadcast %cst_26 : f32 to vector<128x128xf32>
    %144 = arith.select %142, %18, %143 : vector<128x128xi1>, vector<128x128xf32>
    %cst_27 = arith.constant dense<0xFF800000> : vector<128xf32>
    %145 = vector.multi_reduction <maximumf>, %144, %cst_27 [0] : vector<128x128xf32> to vector<128xf32>
    %146 = vector.shape_cast %145 : vector<128xf32> to vector<1x128xf32>
    %c5_i32 = arith.constant 5 : i32
    %147 = vector.broadcast %c5_i32 : i32 to vector<8x1xi32>
    %148 = arith.cmpi eq, %20, %147 : vector<8x1xi32>
    %149 = vector.shape_cast %148 : vector<8x1xi1> to vector<8x1xi1>
    %150 = vector.broadcast %149 : vector<8x1xi1> to vector<8x128xi1>
    %151 = vector.shape_cast %146 : vector<1x128xf32> to vector<1x128xf32>
    %152 = vector.broadcast %151 : vector<1x128xf32> to vector<8x128xf32>
    %153 = arith.select %150, %152, %131 : vector<8x128xi1>, vector<8x128xf32>
    %154 = arith.index_cast %arg0 : i32 to index
    %c12 = arith.constant 12 : index
    %155 = memref.load %arg2[%154, %c12] : memref<1x16xi32, #tpu.memory_space<smem>>
    %156 = arith.index_cast %arg0 : i32 to index
    %c13 = arith.constant 13 : index
    %157 = memref.load %arg2[%156, %c13] : memref<1x16xi32, #tpu.memory_space<smem>>
    %158 = vector.broadcast %155 : i32 to vector<128x1xi32>
    %159 = arith.cmpi sge, %19, %158 : vector<128x1xi32>
    %160 = vector.broadcast %157 : i32 to vector<128x1xi32>
    %161 = arith.cmpi slt, %19, %160 : vector<128x1xi32>
    %162 = arith.andi %159, %161 : vector<128x1xi1>
    %cst_28 = arith.constant 0.000000e+00 : f32
    %163 = vector.shape_cast %162 : vector<128x1xi1> to vector<128x1xi1>
    %164 = vector.broadcast %163 : vector<128x1xi1> to vector<128x128xi1>
    %165 = vector.broadcast %cst_28 : f32 to vector<128x128xf32>
    %166 = arith.select %164, %18, %165 : vector<128x128xi1>, vector<128x128xf32>
    %cst_29 = arith.constant dense<0xFF800000> : vector<128xf32>
    %167 = vector.multi_reduction <maximumf>, %166, %cst_29 [0] : vector<128x128xf32> to vector<128xf32>
    %168 = vector.shape_cast %167 : vector<128xf32> to vector<1x128xf32>
    %c6_i32 = arith.constant 6 : i32
    %169 = vector.broadcast %c6_i32 : i32 to vector<8x1xi32>
    %170 = arith.cmpi eq, %20, %169 : vector<8x1xi32>
    %171 = vector.shape_cast %170 : vector<8x1xi1> to vector<8x1xi1>
    %172 = vector.broadcast %171 : vector<8x1xi1> to vector<8x128xi1>
    %173 = vector.shape_cast %168 : vector<1x128xf32> to vector<1x128xf32>
    %174 = vector.broadcast %173 : vector<1x128xf32> to vector<8x128xf32>
    %175 = arith.select %172, %174, %153 : vector<8x128xi1>, vector<8x128xf32>
    %176 = arith.index_cast %arg0 : i32 to index
    %c14 = arith.constant 14 : index
    %177 = memref.load %arg2[%176, %c14] : memref<1x16xi32, #tpu.memory_space<smem>>
    %178 = arith.index_cast %arg0 : i32 to index
    %c15 = arith.constant 15 : index
    %179 = memref.load %arg2[%178, %c15] : memref<1x16xi32, #tpu.memory_space<smem>>
    %180 = vector.broadcast %177 : i32 to vector<128x1xi32>
    %181 = arith.cmpi sge, %19, %180 : vector<128x1xi32>
    %182 = vector.broadcast %179 : i32 to vector<128x1xi32>
    %183 = arith.cmpi slt, %19, %182 : vector<128x1xi32>
    %184 = arith.andi %181, %183 : vector<128x1xi1>
    %cst_30 = arith.constant 0.000000e+00 : f32
    %185 = vector.shape_cast %184 : vector<128x1xi1> to vector<128x1xi1>
    %186 = vector.broadcast %185 : vector<128x1xi1> to vector<128x128xi1>
    %187 = vector.broadcast %cst_30 : f32 to vector<128x128xf32>
    %188 = arith.select %186, %18, %187 : vector<128x128xi1>, vector<128x128xf32>
    %cst_31 = arith.constant dense<0xFF800000> : vector<128xf32>
    %189 = vector.multi_reduction <maximumf>, %188, %cst_31 [0] : vector<128x128xf32> to vector<128xf32>
    %190 = vector.shape_cast %189 : vector<128xf32> to vector<1x128xf32>
    %c7_i32 = arith.constant 7 : i32
    %191 = vector.broadcast %c7_i32 : i32 to vector<8x1xi32>
    %192 = arith.cmpi eq, %20, %191 : vector<8x1xi32>
    %193 = vector.shape_cast %192 : vector<8x1xi1> to vector<8x1xi1>
    %194 = vector.broadcast %193 : vector<8x1xi1> to vector<8x128xi1>
    %195 = vector.shape_cast %190 : vector<1x128xf32> to vector<1x128xf32>
    %196 = vector.broadcast %195 : vector<1x128xf32> to vector<8x128xf32>
    %197 = arith.select %194, %196, %175 : vector<8x128xi1>, vector<8x128xf32>
    %198 = arith.index_cast %arg0 : i32 to index
    %199 = memref.load %arg1[%198] : memref<1xi32, #tpu.memory_space<smem>>
    %200 = tpu.assume_multiple %199, 8 : i32
    %201 = arith.index_cast %200 : i32 to index
    %c0_32 = arith.constant 0 : index
    %202 = vector.load %arg10[%201, %c0_32] : memref<8x128xf32, #tpu.memory_space<vmem>>, vector<8x128xf32>
    %203 = arith.maximumf %202, %197 : vector<8x128xf32>
    %204 = arith.index_cast %200 : i32 to index
    %c0_33 = arith.constant 0 : index
    %205 = vector.load %arg10[%204, %c0_33] : memref<8x128xf32, #tpu.memory_space<vmem>>, vector<8x128xf32>
    tpu.vector_store %arg10[%204, %c0_33], %203 {strides = array<i32>} : memref<8x128xf32, #tpu.memory_space<vmem>>, vector<8x128xf32>,
    %c0_i32_34 = arith.constant 0 : i32
    %206 = arith.cmpi eq, %arg0, %c0_i32_34 : i32
    %207 = arith.extui %206 : i1 to i32
    %c0_i32_35 = arith.constant 0 : i32
    %208 = arith.cmpi ne, %207, %c0_i32_35 : i32
    scf.if %208 {
      %c0_36 = arith.constant 0 : index
      %c0_37 = arith.constant 0 : index
      %209 = vector.load %arg10[%c0_36, %c0_37] : memref<8x128xf32, #tpu.memory_space<vmem>>, vector<8x128xf32>
      %210 = arith.truncf %209 : vector<8x128xf32> to vector<8x128xbf16>
      %c0_38 = arith.constant 0 : index
      %c0_39 = arith.constant 0 : index
      %211 = vector.load %arg8[%c0_38, %c0_39] : memref<128x128xbf16, #tpu.memory_space<vmem>>, vector<128x128xbf16>
      %cst_40 = arith.constant dense<0.000000e+00> : vector<8x128xf32>
      %212 = tpu.matmul %210, %211, %cst_40 {dimension_numbers = #tpu.dot_dimension_numbers<[1], [0], [0], [1], [0, 0, 1, 1], [], []>} : vector<8x128xbf16>, vector<128x128xbf16>, vector<8x128xf32> -> vector<8x128xf32>
      %c0_41 = arith.constant 0 : index
      %c0_42 = arith.constant 0 : index
      %213 = vector.load %arg9[%c0_41, %c0_42] : memref<8x128xf32, #tpu.memory_space<vmem>>, vector<8x128xf32>
      tpu.vector_store %arg9[%c0_41, %c0_42], %212 {strides = array<i32>} : memref<8x128xf32, #tpu.memory_space<vmem>>, vector<8x128xf32>,
    } else {
    }
    return
  }
  func.func @transform_0(%arg0: i32, %arg1: memref<1xi32, #tpu.memory_space<smem>>, %arg2: memref<1x16xi32, #tpu.memory_space<smem>>) -> (i32, i32) {
    %c0_i32 = arith.constant 0 : i32
    %c0_i32_0 = arith.constant 0 : i32
    return %arg0, %c0_i32 : i32, i32
  }
  func.func @transform_1(%arg0: i32, %arg1: memref<1xi32, #tpu.memory_space<smem>>, %arg2: memref<1x16xi32, #tpu.memory_space<smem>>) -> (i32, i32) {
    %c0_i32 = arith.constant 0 : i32
    %c0_i32_0 = arith.constant 0 : i32
    %c0_i32_1 = arith.constant 0 : i32
    return %c0_i32, %c0_i32_0 : i32, i32
  }
  func.func @transform_2(%arg0: i32, %arg1: memref<1xi32, #tpu.memory_space<smem>>, %arg2: memref<1x16xi32, #tpu.memory_space<smem>>) -> (i32, i32) {
    %c0_i32 = arith.constant 0 : i32
    %c0_i32_0 = arith.constant 0 : i32
    %c0_i32_1 = arith.constant 0 : i32
    return %c0_i32, %c0_i32_0 : i32, i32
  }
  func.func @transform_3(%arg0: i32, %arg1: memref<1xi32, #tpu.memory_space<smem>>, %arg2: memref<1x16xi32, #tpu.memory_space<smem>>) -> (i32, i32) {
    %c0_i32 = arith.constant 0 : i32
    %c0_i32_0 = arith.constant 0 : i32
    %c0_i32_1 = arith.constant 0 : i32
    return %c0_i32, %c0_i32_0 : i32, i32
  }
  func.func @transform_4(%arg0: i32, %arg1: memref<1xi32, #tpu.memory_space<smem>>, %arg2: memref<1x16xi32, #tpu.memory_space<smem>>) -> (i32, i32) {
    %c0_i32 = arith.constant 0 : i32
    %c0_i32_0 = arith.constant 0 : i32
    %c0_i32_1 = arith.constant 0 : i32
    return %c0_i32, %c0_i32_0 : i32, i32
  }
  func.func @transform_5(%arg0: i32, %arg1: memref<1xi32, #tpu.memory_space<smem>>, %arg2: memref<1x16xi32, #tpu.memory_space<smem>>) -> (i32, i32) {
    %c0_i32 = arith.constant 0 : i32
    %c0_i32_0 = arith.constant 0 : i32
    %c0_i32_1 = arith.constant 0 : i32
    return %c0_i32, %c0_i32_0 : i32, i32
  }
  func.func @transform_6(%arg0: i32, %arg1: memref<1xi32, #tpu.memory_space<smem>>, %arg2: memref<1x16xi32, #tpu.memory_space<smem>>) -> (i32, i32) {
    %c0_i32 = arith.constant 0 : i32
    %c0_i32_0 = arith.constant 0 : i32
    %c0_i32_1 = arith.constant 0 : i32
    return %c0_i32, %c0_i32_0 : i32, i32
  }
}

</mosaic_0001>

<bundles_post_ra>
// kernel: tpu_custom_call.1
= control target key start
LH: loop header
LB: loop body
LE: loop exit
PB: predicated region body
PF: predicated region fallthrough
CT: control target
= control target key end

     0   :  { %s4520_s0 = inlined_call_operand.<no memory space> [shape: s32[1], index: 0, kind: input, shape index: {}]   ;;  %s4521_s1 = inlined_call_operand.vmem [shape: s32[1,16], index: 1, kind: input, shape index: {}]   ;;  %s4522_s2 = inlined_call_operand.hbm [shape: bf16[128,128], index: 2, kind: input, shape index: {}]   ;;  %s4523_s3 = inlined_call_operand.hbm [shape: bf16[128,128], index: 3, kind: input, shape index: {}]   ;;  %s4524_s4 = inlined_call_operand.vmem [shape: f32[1,128], index: 4, kind: input, shape index: {}]   ;;  %s4525_s5 = inlined_call_operand.hbm [shape: bf16[128,128], index: 5, kind: input, shape index: {}]   ;;  %s4526_s6 = inlined_call_operand.vmem [shape: f32[1,128], index: 6, kind: input, shape index: {}]   ;;  %s4527_s7 = inlined_call_operand.hbm [shape: bf16[128,128], index: 7, kind: input, shape index: {}]   ;;  %s4528_s8 = inlined_call_operand.hbm [shape: f32[8,128], index: 8, kind: output, shape index: {}]  }
   0x1   :  { %s14_s29 = sshll.u32 %s4521_s1, 4  ;;  %s15_s29 = int_to_ptr.vmem [resolvable:$true] %s14_s29 }
   0x2   :  { %s1916_s30 = scalar_lea.vmem %s15_s29, 16  ;;  %p1921_p1 = scmp.lt.s32.totalorder %s15_s29, %s15_s29 }
   0x3   :  { %p1917_p0 = scmp.ne.s32.totalorder %s15_s29, %s1916_s30  ;;  %p1922_p2 = scmp.lt.s32.totalorder %s1916_s30, %s1916_s30 }
   0x5   :  { %p1923_p3 = por %p1922_p2, %p1921_p1 }
   0x7   :  { %p1924_p4 = pnand %p1923_p3, %p1917_p0 }
   0x9   :  { %1927 = shalt.err (!%p1924_p4)  }
   0xa   :  { %s2048_s9 = smov [#allocation5]  }
   0xb   :  { %17 = dma.vmem_to_smem %s15_s29, 16, %s2048_s9, [#allocation3] }
   0xc   :  { %2038 = dma.done.wait [#allocation3], 16 }
   0xd   :  { %2039 = vsyncadd [#allocation3], 4294967280 }
   0xe   :  { %19 = sfence }
   0xf   :  { %20 = vsyncpa [#allocation7], 0 }
  0x10   :  { %21 = vsyncpa [#allocation10], 0 }
  0x11   :  { %22 = vsyncpa [#allocation13], 0 }
  0x12   :  { %23 = vsyncpa [#allocation8], 0  ;;  %s2049_s10 = smov [#allocation9]   ;;  %s2050_s1 = smov [#allocation6]  }
  0x13   :  { %s41_s11 = sshll.u32 %s2049_s10, 4  ;;  %s29_s12 = sshll.u32 %s2050_s1, 4  ;;  %s42_s11 = int_to_ptr.vmem [resolvable:$true] %s41_s11  ;;  %s2106_s12 = int_to_ptr.vmem [resolvable:$true] %s29_s12 }
  0x14   :  { %s1928_s15 = scalar_lea.hbm %s4523_s3, 1024 }
  0x15   :  { %p1929_p5 = scmp.ne.s32.totalorder %s4523_s3, %s1928_s15  ;;  %p1932_p6 = scmp.lt.u32.totalorder %s1928_s15, %s4523_s3 }
  0x17   :  { %p1934_p7 = pnand %p1932_p6, %p1929_p5 }
  0x19   :  { %1937 = shalt.err (!%p1934_p7)
}
  0x1a   :  { %s1938_s20 = scalar_lea.vmem %s42_s11, 1024  ;;  %p1943_p9 = scmp.lt.s32.totalorder %s42_s11, %s42_s11 }
  0x1b   :  { %p1939_p8 = scmp.ne.s32.totalorder %s42_s11, %s1938_s20  ;;  %p1944_p10 = scmp.lt.s32.totalorder %s1938_s20, %s1938_s20 }
  0x1d   :  { %p1945_p11 = por %p1944_p10, %p1943_p9 }
  0x1f   :  { %p1946_p12 = pnand %p1945_p11, %p1939_p8 }
  0x21   :  { %1949 = shalt.err (!%p1946_p12)
}
  0x22   :  { %s2051_s21 = smov 64   ;;  %s2052_s22 = smov 4  }
  0x23   :  { %47 = dma.hbm_to_vmem [thread:$0]  %s4523_s3, 1024, %s42_s11, [#allocation10], %s2051_s21, %s2051_s21, %s2052_s22  }
  0x24   :  { %s1950_s27 = scalar_lea.hbm %s4522_s2, 1024 }
  0x25   :  { %p1951_p13 = scmp.ne.s32.totalorder %s4522_s2, %s1950_s27  ;;  %p1954_p0 = scmp.lt.u32.totalorder %s1950_s27, %s4522_s2 }
  0x27   :  { %p1956_p1 = pnand %p1954_p0, %p1951_p13 }
  0x29   :  { %1959 = shalt.err (!%p1956_p1)
}
  0x2a   :  { %s1960_s10 = scalar_lea.vmem %s2106_s12, 1024  ;;  %p1965_p3 = scmp.lt.s32.totalorder %s2106_s12, %s2106_s12 }
  0x2b   :  { %p1961_p2 = scmp.ne.s32.totalorder %s2106_s12, %s1960_s10  ;;  %p1966_p4 = scmp.lt.s32.totalorder %s1960_s10, %s1960_s10 }
  0x2d   :  { %p1967_p5 = por %p1966_p4, %p1965_p3 }
  0x2f   :  { %p1968_p6 = pnand %p1967_p5, %p1961_p2 }
  0x31   :  { %1971 = shalt.err (!%p1968_p6)
}
  0x32   :  { %35 = dma.hbm_to_vmem [thread:$0]  %s4522_s2, 1024, %s2106_s12, [#allocation7], %s2051_s21, %s2051_s21, %s2052_s22  }
  0x33   :  { %s2053_s1 = smov [#allocation11]   ;;  %s2054_s14 = smov [#allocation12]  }
  0x34   :  { %s55_s13 = sshll.u32 %s2053_s1, 4  ;;  %s69_s15 = sshll.u32 %s2054_s14, 4  ;;  %s56_s13 = int_to_ptr.vmem [resolvable:$true] %s55_s13  ;;  %s2143_s15 = int_to_ptr.vmem [resolvable:$true] %s69_s15 }
  0x35   :  { %s1972_s18 = scalar_lea.hbm %s4525_s5, 1024 }
  0x36   :  { %p1973_p7 = scmp.ne.s32.totalorder %s4525_s5, %s1972_s18  ;;  %p1976_p8 = scmp.lt.u32.totalorder %s1972_s18, %s4525_s5 }
  0x38   :  { %p1978_p9 = pnand %p1976_p8, %p1973_p7 }
  0x3a   :  { %1981 = shalt.err (!%p1978_p9)
}
  0x3b   :  { %s1982_s2 = scalar_lea.vmem %s56_s13, 1024  ;;  %p1987_p11 = scmp.lt.s32.totalorder %s56_s13, %s56_s13 }
  0x3c   :  { %p1983_p10 = scmp.ne.s32.totalorder %s56_s13, %s1982_s2  ;;  %p1988_p12 = scmp.lt.s32.totalorder %s1982_s2, %s1982_s2 }
  0x3e   :  { %p1989_p13 = por %p1988_p12, %p1987_p11 }
  0x40   :  { %p1990_p0 = pnand %p1989_p13, %p1983_p10 }
  0x42   :  { %1993 = shalt.err (!%p1990_p0)
}
  0x43   :  { %61 = dma.hbm_to_vmem [thread:$0]  %s4525_s5, 1024, %s56_s13, [#allocation10], %s2051_s21, %s2051_s21, %s2052_s22  }
  0x44   :  { %s1994_s28 = scalar_lea.hbm %s4527_s7, 1024 }
  0x45   :  { %p1995_p1 = scmp.ne.s32.totalorder %s4527_s7, %s1994_s28  ;;  %p1998_p2 = scmp.lt.u32.totalorder %s1994_s28, %s4527_s7 }
  0x47   :  { %p2000_p3 = pnand %p1998_p2, %p1995_p1 }
  0x49   :  { %2003 = shalt.err (!%p2000_p3)
}
  0x4a   :  { %s2004_s3 = scalar_lea.vmem %s2143_s15, 1024  ;;  %p2009_p5 = scmp.lt.s32.totalorder %s2143_s15, %s2143_s15 }
  0x4b   :  { %p2005_p4 = scmp.ne.s32.totalorder %s2143_s15, %s2004_s3  ;;  %p2010_p6 = scmp.lt.s32.totalorder %s2004_s3, %s2004_s3 }
  0x4d   :  { %p2011_p7 = por %p2010_p6, %p2009_p5 }
  0x4f   :  { %p2012_p8 = pnand %p2011_p7, %p2005_p4 }
  0x51   :  { %2015 = shalt.err (!%p2012_p8)
}
  0x52   :  { %75 = dma.hbm_to_vmem [thread:$0]  %s4527_s7, 1024, %s2143_s15, [#allocation13], %s2051_s21, %s2051_s21, %s2052_s22  }
  0x53   :  { %2040 = dma.done.wait [#allocation7], 1024  }
  0x54   :  { %2041 = vsyncadd [#allocation7], 4294966272 }
  0x55   :  { %2042 = dma.done.wait [#allocation10], 2048  }
  0x56   :  { %2043 = vsyncadd [#allocation10], 4294965248 }
  0x57   :  { %2044 = dma.done.wait [#allocation13], 1024  }
  0x58   :  { %2045 = vsyncadd [#allocation13], 4294966272  ;;  %v1884_v0 = vld [vmem:[#allocation9] sm:$0xff]   ;;  %v1885_v1 = vld [vmem:[#allocation9 + $0x8] sm:$0xff]   ;;  %vm2056_vm0 = vmmov 0   ;;  %s1726_s22 = sld [smem:[#allocation5 + $0x1]] }
  0x59   :  { %1790 = vmatprep.subr.bf16.mxu0 %v1884_v0  ;;  %v1886_v2 = vld [vmem:[#allocation9 + $0x10] sm:$0xff]   ;;  %v1887_v3 = vld [vmem:[#allocation9 + $0x18] sm:$0xff]   ;;  %v1892_v4 = vld [vmem:[#allocation6] sm:$0xff]   ;;  %s1727_s1 = sld [smem:[#allocation5 + $0x2]]  ;;  %s1728_s13 = sld [smem:[#allocation5 + $0x3]] }
  0x5a   :  { %1791 = vmatpush3.bf16.msra.mxu0 %v1884_v0  ;;  %1806 = vmatprep.mubr.bf16.mxu0 %v1892_v4  ;;  %v1888_v5 = vld [vmem:[#allocation9 + $0x20] sm:$0xff]   ;;  %v1889_v6 = vld [vmem:[#allocation9 + $0x28] sm:$0xff]   ;;  %v1890_v9 = vld [vmem:[#allocation9 + $0x30] sm:$0xff]   ;;  %s1729_s14 = sld [smem:[#allocation5 + $0x4]]  ;;  %s1730_s15 = sld [smem:[#allocation5 + $0x5]] }
  0x5b   :  { %1792 = vmatprep.subr.bf16.mxu0 %v1885_v1  ;;  %v1900_v7 = vld [vmem:[#allocation11] sm:$0xff]   ;;  %v1901_v8 = vld [vmem:[#allocation11 + $0x8] sm:$0xff]   ;;  %v1902_v10 = vld [vmem:[#allocation11 + $0x10] sm:$0xff]   ;;  %s1731_s16 = sld [smem:[#allocation5 + $0x6]]  ;;  %s1732_s17 = sld [smem:[#allocation5 + $0x7]] }
  0x5c   :  { %1822 = vmatprep.subr.bf16.mxu1 %v1900_v7  ;;  %v1891_v11 = vld [vmem:[#allocation9 + $0x38] sm:$0xff]   ;;  %v1904_v13 = vld [vmem:[#allocation11 + $0x20] sm:$0xff]   ;;  %v1893_v14 = vld [vmem:[#allocation6 + $0x8] sm:$0xff]   ;;  %s1733_s18 = sld [smem:[#allocation5 + $0x8]]  ;;  %s1734_s19 = sld [smem:[#allocation5 + $0x9]] }
  0x5d   :  { %1823 = vmatpush3.bf16.msra.mxu1 %v1900_v7  ;;  %v1903_v12 = vld [vmem:[#allocation11 + $0x18] sm:$0xff]   ;;  %v1894_v15 = vld [vmem:[#allocation6 + $0x10] sm:$0xff]   ;;  %v1905_v16 = vld [vmem:[#allocation11 + $0x28] sm:$0xff]   ;;  %s1735_s20 = sld [smem:[#allocation5 + $0xa]]  ;;  %s1736_s23 = sld [smem:[#allocation5 + $0xb]] }
  0x5e   :  { %1793 = vmatpush3.bf16.msra.mxu0 %v1885_v1  ;;  %1824 = vmatprep.subr.bf16.mxu1 %v1901_v8  ;;  %v1895_v17 = vld [vmem:[#allocation6 + $0x18] sm:$0xff]   ;;  %v1896_v18 = vld [vmem:[#allocation6 + $0x20] sm:$0xff]   ;;  %v1897_v19 = vld [vmem:[#allocation6 + $0x28] sm:$0xff]   ;;  %s1737_s24 = sld [smem:[#allocation5 + $0xc]]  ;;  %s1738_s2 = sld [smem:[#allocation5 + $0xd]] }
  0x5f   :  { %1794 = vmatprep.subr.bf16.mxu0 %v1886_v2  ;;  %v1898_v20 = vld [vmem:[#allocation6 + $0x30] sm:$0xff]   ;;  %v1899_v21 = vld [vmem:[#allocation6 + $0x38] sm:$0xff]   ;;  %s1739_s12 = sld [smem:[#allocation5 + $0xe]]  ;;  %s1740_s25 = sld [smem:[#allocation5 + $0xf]] }
  0x60   :  { %v1906_v22 = vld [vmem:[#allocation11 + $0x30] sm:$0xff]   ;;  %v1907_v23 = vld [vmem:[#allocation11 + $0x38] sm:$0xff]   ;;  %s1568_s29 = scalar_lea.vmem [#allocation2], %s4520_s0  ;;  %s2057_s30 = smov [#allocation14]  }
  0x61   :  { %1825 = vmatpush3.bf16.msra.mxu1 %v1901_v8  ;;  %v1700_v24 = vld [vmem:[%s4524_s4] ss:$0 sm:$0xff]  ;;  %s552_s4 = sld [smem:[#allocation5]]  ;;  %s1688_s9 = sshll.u32 %s2057_s30, 4  ;;  %s1689_s9 = int_to_ptr.vmem [resolvable:$true] %s1688_s9 }
  0x62   :  { %1795 = vmatpush3.bf16.msra.mxu0 %v1886_v2  ;;  %1826 = vmatprep.subr.bf16.mxu1 %v1902_v10  ;;  %s2016_s10 = scalar_lea.vmem %s1689_s9, 128  ;;  %p2021_p10 = scmp.lt.s32.totalorder %s1689_s9, %s1689_s9 }
  0x63   :  { %1796 = vmatprep.subr.bf16.mxu0 %v1887_v3  ;;  %p2017_p9 = scmp.ne.s32.totalorder %s1689_s9, %s2016_s10  ;;  %p2022_p11 = scmp.lt.s32.totalorder %s2016_s10, %s2016_s10 }
  0x65   :  { %1827 = vmatpush3.bf16.msra.mxu1 %v1902_v10  ;;  %p2023_p12 = por %p2022_p11, %p2021_p10 }
  0x66   :  { %1797 = vmatpush3.bf16.msra.mxu0 %v1887_v3  ;;  %1828 = vmatprep.subr.bf16.mxu1 %v1903_v12 }
  0x67   :  { %1798 = vmatprep.subr.bf16.mxu0 %v1888_v5  ;;  %p2024_p13 = pnand %p2023_p12, %p2017_p9 }
  0x69   :  { %1829 = vmatpush3.bf16.msra.mxu1 %v1903_v12 }
  0x6a   :  { %1799 = vmatpush3.bf16.msra.mxu0 %v1888_v5  ;;  %1830 = vmatprep.subr.bf16.mxu1 %v1904_v13 }
  0x6b   :  { %1800 = vmatprep.subr.bf16.mxu0 %v1889_v6 }
  0x6d   :  { %1831 = vmatpush3.bf16.msra.mxu1 %v1904_v13 }
  0x6e   :  { %1801 = vmatpush3.bf16.msra.mxu0 %v1889_v6  ;;  %1832 = vmatprep.subr.bf16.mxu1 %v1905_v16 }
  0x6f   :  { %1802 = vmatprep.subr.bf16.mxu0 %v1890_v9 }
  0x71   :  { %1833 = vmatpush3.bf16.msra.mxu1 %v1905_v16 }
  0x72   :  { %1803 = vmatpush3.bf16.msra.mxu0 %v1890_v9  ;;  %1834 = vmatprep.subr.bf16.mxu1 %v1906_v22 }
  0x73   :  { %1804 = vmatprep.subr.bf16.mxu0 %v1891_v11 }
  0x75   :  { %1835 = vmatpush3.bf16.msra.mxu1 %v1906_v22  ;;  %v1912_v22 = vld [vmem:[#allocation12 + $0x20] sm:$0xff]  }
  0x76   :  { %1805 = vmatpush3.bf16.msra.mxu0 %v1891_v11  ;;  %1836 = vmatprep.subr.bf16.mxu1 %v1907_v23 }
  0x79   :  { %1807 = vmatmul.mubr.bf16.vlgmr.msra.gmra.mrb[0].mxu0 %v1893_v14  ;;  %1837 = vmatpush3.bf16.msra.mxu1 %v1907_v23  ;;  %v534_v23 = vlaneseq }
  0x7a   :  { %1810 = vmatprep.mubr.bf16.mxu0 %v1894_v15 }
  0x81   :  { %1811 = vmatmul.mubr.bf16.gmra.mrb[4].mxu0 %v1895_v17  ;;  %v1908_v17 = vld [vmem:[#allocation12] sm:$0xff]  }
  0x82   :  { %1814 = vmatprep.mubr.bf16.mxu0 %v1896_v18  ;;  %v2055_v18 = vmov 0.0  }
  0x83   :  { %1854 = vmatprep.subr.bf16.mxu0 %v2055_v18  ;;  %93 = vst [vmem:[#allocation2] sm:$0xff] %v2055_v18 }
  0x84   :  { %1855 = vmatpush3.bf16.msra.mxu0 %v1908_v17 }
  0x85   :  { %1856 = vmatprep.subr.bf16.mxu0 %v2055_v18 }
  0x89   :  { %1815 = vmatmul.mubr.bf16.gmra.mrb[8].mxu0 %v1897_v19  ;;  %v1909_v19 = vld [vmem:[#allocation12 + $0x8] sm:$0xff]  }
  0x8a   :  { %1818 = vmatprep.mubr.bf16.mxu0 %v1898_v20  ;;  %1857 = vmatpush3.bf16.msra.mxu0 %v1909_v19  ;;  %v1910_v20 = vld [vmem:[#allocation12 + $0x10] sm:$0xff]  }
  0x8b   :  { %1858 = vmatprep.subr.bf16.mxu0 %v2055_v18 }
  0x8e   :  { %1859 = vmatpush3.bf16.msra.mxu0 %v1910_v20 }
  0x8f   :  { %1860 = vmatprep.subr.bf16.mxu0 %v2055_v18 }
  0x91   :  { %1819 = vmatmul.mubr.bf16.gmra.mrb[12].mxu0 %v1899_v21  ;;  %v1911_v21 = vld [vmem:[#allocation12 + $0x18] sm:$0xff]  }
  0x92   :  { %1870 = vmatprep.mubr.msk.bf16.mxu0 %vm2056_vm0, %v2055_v18  ;;  %1861 = vmatpush3.bf16.msra.mxu0 %v1911_v21 }
  0x93   :  { %1862 = vmatprep.subr.bf16.mxu0 %v2055_v18 }
  0x96   :  { %1863 = vmatpush3.bf16.msra.mxu0 %v1912_v22 }
  0x97   :  { %1864 = vmatprep.subr.bf16.mxu0 %v2055_v18 }
 0x14c   :  { %v1808_v25 = vpop.f32.mrb[0].mxu0 }
 0x14d   :  { %v272_v26 = vadd.f32 %v1808_v25, %v1700_v24  ;;  %v263_v27 = vpop.f32.mrb[1].mxu0  ;;  %v2183_v25 = vshrl.u32 %v534_v23, 7 }
 0x14e   :  { %v264_v28 = vadd.f32 %v1700_v24, %v263_v27  ;;  %v1809_v29 = vpop.f32.mrb[2].mxu0 }
 0x14f   :  { %v275_v30 = vadd.f32 %v1809_v29, %v1700_v24  ;;  %v266_v31 = vpop.f32.mrb[3].mxu0  ;;  %v328_v33 = vmax.f32 %v272_v26, 0.0  ;;  %4539 = vst [vmem:[#allocation20_spill] sm:$0xff] %v2183_v25  ;;  %v1914_v26 = vld [vmem:[#allocation12 + $0x30] sm:$0xff]   ;;  %v2186_v27 = vadd.s32 16, %v2183_v25  ;;  %v2190_v29 = vstv %s1726_s22 }
 0x150   :  { %v267_v32 = vadd.f32 %v1700_v24, %v266_v31  ;;  %v326_v35 = vmax.f32 %v264_v28, 0.0  ;;  %v2188_v28 = vstv %s552_s4  ;;  %v2194_v31 = vstv %s1728_s13 }
 0x151   :  { %v329_v34 = vmax.f32 %v275_v30, 0.0  ;;  %v2192_v30 = vstv %s1727_s1  ;;  %vm558_vm1 = vcmp.ge.s32.totalorder %v2186_v27, %v2188_v28  ;;  %vm575_vm2 = vcmp.lt.s32.totalorder %v2186_v27, %v2190_v29 }
 0x152   :  { %v327_v36 = vmax.f32 %v267_v32, 0.0  ;;  %v1915_v32 = vld [vmem:[#allocation12 + $0x38] sm:$0xff]   ;;  %vm685_vm3 = vcmp.ge.s32.totalorder %v2186_v27, %v2192_v30  ;;  %vm702_vm4 = vcmp.lt.s32.totalorder %v2186_v27, %v2194_v31  ;;  %vm2308_vm14 = vmand %vm558_vm1, %vm575_vm2  ;;  %vm4563_vm13 = vcmp.lt.s32.totalorder %v2183_v25, %v2190_v29 }
 0x153   :  { %v343_v37 = vpack.c.bf16 %v329_v34, %v328_v33  ;;  %v2196_v33 = vstv %s1729_s14  ;;  %v2198_v34 = vstv %s1730_s15  ;;  %vm2318_vm11 = vmand %vm685_vm3, %vm702_vm4  ;;  %vm4568_vm9 = vcmp.ge.s32.totalorder %v2183_v25, %v2192_v30 }
 0x154   :  { %v1812_v38 = vpop.f32.mrb[4].mxu0  ;;  %v342_v39 = vpack.c.bf16 %v327_v36, %v326_v35  ;;  %v2200_v35 = vstv %s1731_s16  ;;  %v2202_v36 = vstv %s1732_s17  ;;  %vm812_vm5 = vcmp.ge.s32.totalorder %v2186_v27, %v2196_v33 }
 0x155   :  { %v288_v40 = vadd.f32 %v1812_v38, %v1700_v24  ;;  %v279_v41 = vpop.f32.mrb[5].mxu0  ;;  %v2214_v38 = vstv %s1734_s19  ;;  %vm829_vm6 = vcmp.lt.s32.totalorder %v2186_v27, %v2198_v34  ;;  %vm939_vm7 = vcmp.ge.s32.totalorder %v2186_v27, %v2200_v35 }
 0x156   :  { %v280_v42 = vadd.f32 %v1700_v24, %v279_v41  ;;  %v1813_v43 = vpop.f32.mrb[6].mxu0  ;;  %1838 = vmatprep.mubr.bf16.mxu1 %v342_v39  ;;  %v2216_v39 = vstv %s1735_s20  ;;  %v2220_v41 = vstv %s1737_s24  ;;  %vm956_vm8 = vcmp.lt.s32.totalorder %v2186_v27, %v2202_v36  ;;  %vm2328_vm1 = vmand %vm812_vm5, %vm829_vm6 }
 0x157   :  { %v291_v44 = vadd.f32 %v1813_v43, %v1700_v24  ;;  %v282_v45 = vpop.f32.mrb[7].mxu0  ;;  %1839 = vmatmul.mubr.bf16.vlgmr.msra.gmra.mrb[0].mxu1 %v343_v37  ;;  %v332_v47 = vmax.f32 %v288_v40, 0.0  ;;  %v2212_v37 = vstv %s1733_s18  ;;  %v2218_v40 = vstv %s1736_s23  ;;  %vm2338_vm2 = vmand %vm939_vm7, %vm956_vm8 }
 0x158   :  { %v283_v46 = vadd.f32 %v1700_v24, %v282_v45  ;;  %v330_v49 = vmax.f32 %v280_v42, 0.0  ;;  %v2222_v42 = vstv %s1738_s2  ;;  %v2224_v43 = vstv %s1739_s12 }
 0x159   :  { %v333_v48 = vmax.f32 %v291_v44, 0.0  ;;  %v2226_v44 = vstv %s1740_s25  ;;  %vm1083_vm10 = vcmp.lt.s32.totalorder %v2186_v27, %v2214_v38  ;;  %v2259_v45 = vadd.s32 24, %v2183_v25 }
 0x15a   :  { %v331_v50 = vmax.f32 %v283_v46, 0.0  ;;  %v2292_v46 = vadd.s32 8, %v2183_v25  ;;  %vm4548_vm7 = vcmp.ge.s32.totalorder %v2186_v27, %v2212_v37  ;;  %vm4551_vm3 = vcmp.lt.s32.totalorder %v2186_v27, %v2218_v40 }
 0x15b   :  { %v345_v51 = vpack.c.bf16 %v333_v48, %v332_v47  ;;  %vm2356_vm8 = vmand %vm4548_vm7, %vm1083_vm10  ;;  %vm4552_vm4 = vcmp.ge.s32.totalorder %v2186_v27, %v2216_v39  ;;  %vm4555_vm6 = vcmp.lt.s32.totalorder %v2186_v27, %v2222_v42  ;;  %vm4556_vm12 = vcmp.ge.s32.totalorder %v2186_v27, %v2220_v41 }
 0x15c   :  { %v344_v52 = vpack.c.bf16 %v331_v50, %v330_v49  ;;  %v1816_v53 = vpop.f32.mrb[8].mxu0  ;;  %vm2366_vm5 = vmand %vm4552_vm4, %vm4551_vm3  ;;  %vm4559_vm7 = vcmp.lt.s32.totalorder %v2186_v27, %v2226_v44  ;;  %vm4560_vm0 = vcmp.ge.s32.totalorder %v2186_v27, %v2224_v43  ;;  %vm4567_vm4 = vcmp.lt.s32.totalorder %v2183_v25, %v2194_v31 }
 0x15d   :  { %v304_v54 = vadd.f32 %v1816_v53, %v1700_v24  ;;  %v295_v55 = vpop.f32.mrb[9].mxu0  ;;  %vm2376_vm10 = vmand %vm4556_vm12, %vm4555_vm6  ;;  %vm4571_vm6 = vcmp.lt.s32.totalorder %v2183_v25, %v2198_v34  ;;  %vm4572_vm15 = vcmp.ge.s32.totalorder %v2183_v25, %v2196_v33  ;;  %v2610_v17 = vadd.s32 88, %v2183_v25 }
 0x15e   :  { %v296_v56 = vadd.f32 %v1700_v24, %v295_v55  ;;  %v1817_v57 = vpop.f32.mrb[10].mxu0  ;;  %1842 = vmatprep.mubr.bf16.mxu1 %v344_v52  ;;  %vm2386_vm3 = vmand %vm4560_vm0, %vm4559_vm7  ;;  %vm4564_vm0 = vcmp.ge.s32.totalorder %v2183_v25, %v2188_v28  ;;  %v4565_v55 = vmov 0  ;;  %v2616_v19 = vadd.s32 112, %v2183_v25 }
 0x15f   :  { %v307_v58 = vadd.f32 %v1817_v57, %v1700_v24  ;;  %v298_v59 = vpop.f32.mrb[11].mxu0  ;;  %1843 = vmatmul.mubr.bf16.gmra.mrb[4].mxu1 %v345_v51  ;;  %v336_v61 = vmax.f32 %v304_v54, 0.0  ;;  %vm2404_vm7 = vmand %vm4564_vm0, %vm4563_vm13  ;;  %v4573_v57 = vmov 0  ;;  %v2661_v27 = vadd.s32 96, %v2183_v25 }
 0x160   :  { %v299_v60 = vadd.f32 %v1700_v24, %v298_v59  ;;  %v334_v63 = vmax.f32 %v296_v56, 0.0  ;;  %v4566_v55 = vsel %vm2404_vm7, 4294967295, %v4565_v55  ;;  %vm2414_vm12 = vmand %vm4568_vm9, %vm4567_vm4  ;;  %v4569_v56 = vmov 0  ;;  %4611 = vst [vmem:[#allocation21_spill] sm:$0xff] %v2616_v19 }
 0x161   :  { %v337_v62 = vmax.f32 %v307_v58, 0.0  ;;  %v4570_v56 = vsel %vm2414_vm12, 4294967295, %v4569_v56  ;;  %vm2424_vm13 = vmand %vm4572_vm15, %vm4571_vm6  ;;  %vm4575_vm12 = vcmp.lt.s32.totalorder %v2183_v25, %v2202_v36  ;;  %vm4576_vm15 = vcmp.ge.s32.totalorder %v2183_v25, %v2200_v35  ;;  %4624 = vst [vmem:[#allocation22_spill] sm:$0xff] %v2661_v27 }
 0x162   :  { %v335_v0 = vmax.f32 %v299_v60, 0.0  ;;  %v4574_v57 = vsel %vm2424_vm13, 4294967295, %v4573_v57  ;;  %vm2442_vm6 = vmand %vm4576_vm15, %vm4575_vm12  ;;  %v4577_v58 = vmov 0  ;;  %v2453_v59 = vadd.s32 48, %v2183_v25  ;;  %v2458_v60 = vld [vmem:[%s4526_s6] ss:$0 sm:$0xff] }
 0x163   :  { %v347_v1 = vpack.c.bf16 %v337_v62, %v336_v61  ;;  %v4578_v58 = vsel %vm2442_vm6, 4294967295, %v4577_v58  ;;  %vm4579_vm12 = vcmp.lt.s32.totalorder %v2183_v25, %v2214_v38  ;;  %vm4580_vm15 = vcmp.ge.s32.totalorder %v2183_v25, %v2212_v37 }
 0x164   :  { %v346_v2 = vpack.c.bf16 %v335_v0, %v334_v63  ;;  %v1820_v3 = vpop.f32.mrb[12].mxu0  ;;  %vm2466_vm0 = vmand %vm4580_vm15, %vm4579_vm12  ;;  %v4581_v61 = vmov 0  ;;  %vm4583_vm13 = vcmp.lt.s32.totalorder %v2183_v25, %v2218_v40  ;;  %vm4584_vm12 = vcmp.ge.s32.totalorder %v2183_v25, %v2216_v39 }
 0x165   :  { %v320_v4 = vadd.f32 %v1820_v3, %v1700_v24  ;;  %v311_v5 = vpop.f32.mrb[13].mxu0  ;;  %v4582_v61 = vsel %vm2466_vm0, 4294967295, %v4581_v61  ;;  %vm2484_vm15 = vmand %vm4584_vm12, %vm4583_vm13  ;;  %v4585_v62 = vmov 0  ;;  %vm4587_vm0 = vcmp.lt.s32.totalorder %v2183_v25, %v2222_v42 }
 0x166   :  { %v312_v6 = vadd.f32 %v1700_v24, %v311_v5  ;;  %v1821_v7 = vpop.f32.mrb[14].mxu0  ;;  %1846 = vmatprep.mubr.bf16.mxu1 %v346_v2  ;;  %v4586_v62 = vsel %vm2484_vm15, 4294967295, %v4585_v62  ;;  %vm4588_vm13 = vcmp.ge.s32.totalorder %v2183_v25, %v2220_v41  ;;  %v4589_v0 = vmov 0 }
 0x167   :  { %v323_v8 = vadd.f32 %v1821_v7, %v1700_v24  ;;  %v314_v9 = vpop.f32.mrb[15].mxu0  ;;  %1847 = vmatmul.mubr.bf16.gmra.mrb[8].mxu1 %v347_v1  ;;  %v340_v11 = vmax.f32 %v320_v4, 0.0  ;;  %vm2502_vm12 = vmand %vm4588_vm13, %vm4587_vm0  ;;  %v2513_v1 = vadd.s32 32, %v2183_v25  ;;  %vm4591_vm0 = vcmp.lt.s32.totalorder %v2183_v25, %v2226_v44 }
 0x168   :  { %v315_v10 = vadd.f32 %v1700_v24, %v314_v9  ;;  %v338_v13 = vmax.f32 %v312_v6, 0.0  ;;  %v1913_v24 = vld [vmem:[#allocation12 + $0x28] sm:$0xff]   ;;  %v4590_v0 = vsel %vm2502_vm12, 4294967295, %v4589_v0  ;;  %vm4592_vm13 = vcmp.ge.s32.totalorder %v2183_v25, %v2224_v43 }
 0x169   :  { %v341_v12 = vmax.f32 %v323_v8, 0.0  ;;  %1865 = vmatpush3.bf16.msra.mxu0 %v1913_v24  ;;  %vm2522_vm9 = vmand %vm4592_vm13, %vm4591_vm0  ;;  %v4593_v4 = vmov 0  ;;  %v2539_v5 = vadd.s32 56, %v2183_v25  ;;  %vm4595_vm13 = vcmp.lt.s32.totalorder %v2259_v45, %v2190_v29 }
 0x16a   :  { %v339_v14 = vmax.f32 %v315_v10, 0.0  ;;  %1866 = vmatprep.subr.bf16.mxu0 %v2055_v18  ;;  %v4594_v4 = vsel %vm2522_vm9, 4294967295, %v4593_v4  ;;  %vm4596_vm7 = vcmp.ge.s32.totalorder %v2259_v45, %v2188_v28  ;;  %v4597_v8 = vmov 0 }
 0x16b   :  { %v349_v15 = vpack.c.bf16 %v341_v12, %v340_v11  ;;  %vm2548_vm4 = vmand %vm4596_vm7, %vm4595_vm13  ;;  %vm4599_vm15 = vcmp.lt.s32.totalorder %v2259_v45, %v2194_v31  ;;  %vm4600_vm0 = vcmp.ge.s32.totalorder %v2259_v45, %v2192_v30  ;;  %v4601_v9 = vmov 0 }
 0x16c   :  { %v348_v16 = vpack.c.bf16 %v339_v14, %v338_v13  ;;  %v4598_v8 = vsel %vm2548_vm4, 4294967295, %v4597_v8  ;;  %vm2558_vm12 = vmand %vm4600_vm0, %vm4599_vm15  ;;  %vm4603_vm6 = vcmp.lt.s32.totalorder %v2259_v45, %v2198_v34  ;;  %vm4604_vm9 = vcmp.ge.s32.totalorder %v2259_v45, %v2196_v33 }
 0x16d   :  { %1867 = vmatpush3.bf16.msra.mxu0 %v1914_v26  ;;  %v4602_v9 = vsel %vm2558_vm12, 4294967295, %v4601_v9  ;;  %vm2568_vm7 = vmand %vm4604_vm9, %vm4603_vm6  ;;  %v4605_v10 = vmov 0  ;;  %v2577_v11 = vadd.s32 40, %v2183_v25  ;;  %v2580_v12 = vadd.s32 80, %v2183_v25 }
 0x16e   :  { %1850 = vmatprep.mubr.bf16.mxu1 %v348_v16  ;;  %1868 = vmatprep.subr.bf16.mxu0 %v2055_v18  ;;  %v4606_v10 = vsel %vm2568_vm7, 4294967295, %v4605_v10  ;;  %v2583_v13 = vadd.s32 64, %v2183_v25  ;;  %vm4607_vm9 = vcmp.lt.s32.totalorder %v2259_v45, %v2202_v36  ;;  %vm4608_vm6 = vcmp.ge.s32.totalorder %v2259_v45, %v2200_v35 }
 0x16f   :  { %1851 = vmatmul.mubr.bf16.gmra.mrb[12].mxu1 %v349_v15  ;;  %vm2593_vm15 = vmand %vm4608_vm6, %vm4607_vm9  ;;  %v4609_v15 = vmov 0  ;;  %v2613_v18 = vadd.s32 72, %v2183_v25  ;;  %vm4612_vm6 = vcmp.lt.s32.totalorder %v2259_v45, %v2214_v38  ;;  %vm4613_vm12 = vcmp.ge.s32.totalorder %v2259_v45, %v2212_v37 }
 0x170   :  { %v4610_v15 = vsel %vm2593_vm15, 4294967295, %v4609_v15  ;;  %vm2629_vm9 = vmand %vm4613_vm12, %vm4612_vm6  ;;  %vm4616_vm4 = vcmp.lt.s32.totalorder %v2259_v45, %v2218_v40  ;;  %vm4617_vm7 = vcmp.ge.s32.totalorder %v2259_v45, %v2216_v39  ;;  %vm4620_vm13 = vcmp.lt.s32.totalorder %v2259_v45, %v2222_v42 }
 0x171   :  { %1869 = vmatpush3.bf16.msra.mxu0 %v1915_v32  ;;  %vm2639_vm0 = vmand %vm4617_vm7, %vm4616_vm4  ;;  %vm4621_vm15 = vcmp.ge.s32.totalorder %v2259_v45, %v2220_v41  ;;  %vm4625_vm7 = vcmp.lt.s32.totalorder %v2259_v45, %v2226_v44  ;;  %vm4630_vm6 = vcmp.ge.s32.totalorder %v2292_v46, %v2188_v28  ;;  %v4651_v27 = vmov 0 }
 0x172   :  { %vm2649_vm12 = vmand %vm4621_vm15, %vm4620_vm13  ;;  %vm4626_vm13 = vcmp.ge.s32.totalorder %v2259_v45, %v2224_v43 }
 0x173   :  { %vm2681_vm15 = vmand %vm4626_vm13, %vm4625_vm7  ;;  %vm4629_vm13 = vcmp.lt.s32.totalorder %v2292_v46, %v2190_v29 }
 0x174   :  { %vm2715_vm7 = vmand %vm4630_vm6, %vm4629_vm13  ;;  %vm4645_vm13 = vcmp.lt.s32.totalorder %v2292_v46, %v2202_v36 }
 0x22a   :  { %v1840_v63 = vpop.f32.mrb[0].mxu1 }
 0x22b   :  { %v464_v2 = vadd.f32 %v1840_v63, %v2458_v60  ;;  %v455_v3 = vpop.f32.mrb[1].mxu1 }
 0x22c   :  { %v456_v6 = vadd.f32 %v2458_v60, %v455_v3  ;;  %v1841_v7 = vpop.f32.mrb[2].mxu1 }
 0x22d   :  { %v2585_v14 = vmax.f32 %v464_v2, 0.0  ;;  %v458_v16 = vpop.f32.mrb[3].mxu1  ;;  %v2621_v21 = vadd.f32 %v1841_v7, %v2458_v60 }
 0x22e   :  { %v2618_v20 = vmax.f32 %v456_v6, 0.0  ;;  %v2654_v26 = vadd.f32 %v2458_v60, %v458_v16 }
 0x22f   :  { %v639_v32 = vsel %vm2308_vm14, %v2585_v14, 0.0  ;;  %v766_v63 = vsel %vm2318_vm11, %v2585_v14, 0.0  ;;  %v893_v2 = vsel %vm2328_vm1, %v2585_v14, 0.0  ;;  %v1020_v3 = vsel %vm2338_vm2, %v2585_v14, 0.0 }
 0x230   :  { %v1147_v45 = vsel %vm2356_vm8, %v2585_v14, 0.0  ;;  %v1274_v48 = vsel %vm2366_vm5, %v2585_v14, 0.0  ;;  %v1401_v49 = vsel %vm2376_vm10, %v2585_v14, 0.0  ;;  %v1528_v50 = vsel %vm2386_vm3, %v2585_v14, 0.0 }
 0x231   :  { %vm4633_vm5 = vcmp.lt.s32.totalorder %v2292_v46, %v2194_v31  ;;  %vm4634_vm8 = vcmp.ge.s32.totalorder %v2292_v46, %v2192_v30  ;;  %vm4637_vm3 = vcmp.lt.s32.totalorder %v2292_v46, %v2198_v34  ;;  %vm4638_vm1 = vcmp.ge.s32.totalorder %v2292_v46, %v2196_v33 }
 0x232   :  { %vm2725_vm10 = vmand %vm4634_vm8, %vm4633_vm5  ;;  %vm4641_vm5 = vnez %v4566_v55  ;;  %vm4642_vm8 = vnez %v4570_v56  ;;  %vm4646_vm2 = vcmp.ge.s32.totalorder %v2292_v46, %v2200_v35  ;;  %v1844_v19 = vpop.f32.mrb[4].mxu1  ;;  %vm4657_vm14 = vcmp.lt.s32.totalorder %v2292_v46, %v2218_v40 }
 0x233   :  { %vm2735_vm6 = vmand %vm4638_vm1, %vm4637_vm3  ;;  %v637_v54 = vsel %vm4641_vm5, %v2618_v20, 0.0  ;;  %v764_v6 = vsel %vm4642_vm8, %v2618_v20, 0.0  ;;  %vm4643_vm1 = vnez %v4574_v57  ;;  %vm4644_vm3 = vnez %v4578_v58 }
 0x234   :  { %v891_v7 = vsel %vm4643_vm1, %v2618_v20, 0.0  ;;  %v1018_v14 = vsel %vm4644_vm3, %v2618_v20, 0.0  ;;  %vm2761_vm11 = vmand %vm4646_vm2, %vm4645_vm13  ;;  %v655_v56 = vmax.f32 %v639_v32, %v637_v54  ;;  %v782_v57 = vmax.f32 %v766_v63, %v764_v6 }
 0x235   :  { %v909_v58 = vmax.f32 %v893_v2, %v891_v7  ;;  %v1036_v16 = vmax.f32 %v1020_v3, %v1018_v14  ;;  %vm4649_vm13 = vcmp.lt.s32.totalorder %v2292_v46, %v2214_v38  ;;  %vm4650_vm5 = vcmp.ge.s32.totalorder %v2292_v46, %v2212_v37 }
 0x236   :  { %vm2783_vm1 = vmand %vm4650_vm5, %vm4649_vm13  ;;  %vm4653_vm3 = vnez %v4582_v61  ;;  %vm4654_vm8 = vnez %v4586_v62  ;;  %vm4655_vm5 = vnez %v4590_v0  ;;  %vm4656_vm13 = vnez %v4594_v4  ;;  %v471_v62 = vpop.f32.mrb[5].mxu1 }
 0x237   :  { %v4652_v27 = vsel %vm2783_vm1, 4294967295, %v4651_v27  ;;  %v1145_v32 = vsel %vm4653_vm3, %v2618_v20, 0.0  ;;  %v1272_v63 = vsel %vm4654_vm8, %v2618_v20, 0.0  ;;  %v1399_v2 = vsel %vm4655_vm5, %v2618_v20, 0.0  ;;  %v1845_v7 = vpop.f32.mrb[6].mxu1 }
 0x238   :  { %v1526_v3 = vsel %vm4656_vm13, %v2618_v20, 0.0  ;;  %vm4658_vm2 = vcmp.ge.s32.totalorder %v2292_v46, %v2216_v39  ;;  %v4659_v61 = vmov 0  ;;  %v1163_v0 = vmax.f32 %v1147_v45, %v1145_v32 }
 0x239   :  { %vm2809_vm4 = vmand %vm4658_vm2, %vm4657_vm14  ;;  %v1290_v4 = vmax.f32 %v1274_v48, %v1272_v63  ;;  %v1417_v20 = vmax.f32 %v1401_v49, %v1399_v2  ;;  %v1544_v54 = vmax.f32 %v1528_v50, %v1526_v3  ;;  %vm4661_vm2 = vcmp.lt.s32.totalorder %v2292_v46, %v2222_v42 }
 0x23a   :  { %v4660_v61 = vsel %vm2809_vm4, 4294967295, %v4659_v61  ;;  %vm4662_vm8 = vcmp.ge.s32.totalorder %v2292_v46, %v2220_v41  ;;  %v4663_v6 = vmov 0  ;;  %v521_v45 = vmax.f32 %v2621_v21, 0.0 }
 0x23b   :  { %vm2831_vm5 = vmand %vm4662_vm8, %vm4661_vm2  ;;  %v2841_v48 = vmax.f32 %v2654_v26, 0.0  ;;  %vm4665_vm13 = vcmp.lt.s32.totalorder %v2292_v46, %v2226_v44  ;;  %vm4666_vm8 = vcmp.ge.s32.totalorder %v2292_v46, %v2224_v43  ;;  %v4667_v49 = vmov 0  ;;  %v474_v46 = vpop.f32.mrb[7].mxu1 }
 0x23c   :  { %v4664_v6 = vsel %vm2831_vm5, 4294967295, %v4663_v6  ;;  %vm2849_vm2 = vmand %vm4666_vm8, %vm4665_vm13  ;;  %v2866_v21 = vadd.s32 120, %v2183_v25  ;;  %v2869_v26 = vadd.s32 104, %v2183_v25  ;;  %v2872_v50 = vadd.f32 %v1844_v19, %v2458_v60 }
 0x23d   :  { %v4668_v49 = vsel %vm2849_vm2, 4294967295, %v4667_v49  ;;  %vm4671_vm8 = vcmp.lt.s32.totalorder %v2453_v59, %v2190_v29  ;;  %vm4672_vm3 = vcmp.ge.s32.totalorder %v2453_v59, %v2188_v28  ;;  %v4673_v14 = vmov 0 }
 0x23e   :  { %4669 = vst [vmem:[#allocation23_spill] sm:$0xff] %v2866_v21  ;;  %4670 = vst [vmem:[#allocation24_spill] sm:$0xff] %v2869_v26  ;;  %vm4675_vm13 = vcmp.lt.s32.totalorder %v2453_v59, %v2194_v31  ;;  %vm4676_vm5 = vcmp.ge.s32.totalorder %v2453_v59, %v2192_v30  ;;  %v4677_v32 = vmov 0  ;;  %vm4679_vm14 = vcmp.lt.s32.totalorder %v2453_v59, %v2198_v34 }
 0x23f   :  { %vm2880_vm4 = vmand %vm4672_vm3, %vm4671_vm8  ;;  %vm4680_vm2 = vcmp.ge.s32.totalorder %v2453_v59, %v2196_v33  ;;  %v4681_v19 = vmov 0  ;;  %v2905_v63 = vadd.f32 %v2458_v60, %v471_v62  ;;  %v2908_v2 = vadd.f32 %v1845_v7, %v2458_v60 }
 0x240   :  { %v4674_v14 = vsel %vm2880_vm4, 4294967295, %v4673_v14  ;;  %vm2890_vm1 = vmand %vm4676_vm5, %vm4675_vm13  ;;  %v2915_v3 = vadd.f32 %v2458_v60, %v474_v46  ;;  %vm4685_vm8 = vnez %v4606_v10  ;;  %vm4687_vm5 = vcmp.lt.s32.totalorder %v2453_v59, %v2202_v36 }
 0x241   :  { %v4678_v32 = vsel %vm2890_vm1, 4294967295, %v4677_v32  ;;  %vm2900_vm3 = vmand %vm4680_vm2, %vm4679_vm14  ;;  %vm4683_vm14 = vnez %v4598_v8  ;;  %vm4684_vm2 = vnez %v4602_v9  ;;  %v894_v62 = vsel %vm4685_vm8, %v521_v45, 0.0 }
 0x242   :  { %v4682_v19 = vsel %vm2900_vm3, 4294967295, %v4681_v19  ;;  %v640_v25 = vsel %vm4683_vm14, %v521_v45, 0.0  ;;  %v767_v26 = vsel %vm4684_vm2, %v521_v45, 0.0  ;;  %vm4686_vm3 = vnez %v4610_v15 }
 0x243   :  { %v1021_v7 = vsel %vm4686_vm3, %v521_v45, 0.0  ;;  %vm4688_vm13 = vcmp.ge.s32.totalorder %v2453_v59, %v2200_v35  ;;  %v4689_v46 = vmov 0  ;;  %v653_v8 = vmax.f32 %v640_v25, %v655_v56 }
 0x244   :  { %vm2931_vm1 = vmand %vm4688_vm13, %vm4687_vm5  ;;  %v780_v9 = vmax.f32 %v767_v26, %v782_v57  ;;  %v907_v10 = vmax.f32 %v894_v62, %v909_v58  ;;  %v1034_v15 = vmax.f32 %v1021_v7, %v1036_v16  ;;  %vm4691_vm13 = vcmp.lt.s32.totalorder %v2453_v59, %v2214_v38 }
 0x245   :  { %v4690_v46 = vsel %vm2931_vm1, 4294967295, %v4689_v46  ;;  %vm4692_vm14 = vcmp.ge.s32.totalorder %v2453_v59, %v2212_v37  ;;  %v4693_v21 = vmov 0  ;;  %vm4695_vm4 = vcmp.lt.s32.totalorder %v2453_v59, %v2218_v40 }
 0x246   :  { %vm2953_vm8 = vmand %vm4692_vm14, %vm4691_vm13  ;;  %vm4696_vm5 = vcmp.ge.s32.totalorder %v2453_v59, %v2216_v39  ;;  %vm4699_vm2 = vcmp.lt.s32.totalorder %v2453_v59, %v2222_v42  ;;  %vm4700_vm1 = vcmp.ge.s32.totalorder %v2453_v59, %v2220_v41  ;;  %v1148_v57 = vsel %vm2629_vm9, %v521_v45, 0.0 }
 0x247   :  { %v4694_v21 = vsel %vm2953_vm8, 4294967295, %v4693_v21  ;;  %vm2963_vm3 = vmand %vm4696_vm5, %vm4695_vm4  ;;  %v1275_v58 = vsel %vm2639_vm0, %v521_v45, 0.0  ;;  %v1402_v16 = vsel %vm2649_vm12, %v521_v45, 0.0  ;;  %v1529_v26 = vsel %vm2681_vm15, %v521_v45, 0.0 }
 0x248   :  { %vm2973_vm14 = vmand %vm4700_vm1, %vm4699_vm2  ;;  %vm4703_vm4 = vcmp.lt.s32.totalorder %v2453_v59, %v2226_v44  ;;  %vm4704_vm1 = vcmp.ge.s32.totalorder %v2453_v59, %v2224_v43  ;;  %v1161_v22 = vmax.f32 %v1148_v57, %v1163_v0  ;;  %v1288_v23 = vmax.f32 %v1275_v58, %v1290_v4  ;;  %v4897_v59 = vld [vmem:[#allocation21_spill] sm:$0xff] }
 0x249   :  { %vm2995_vm2 = vmand %vm4704_vm1, %vm4703_vm4  ;;  %v1415_v24 = vmax.f32 %v1402_v16, %v1417_v20  ;;  %v1542_v47 = vmax.f32 %v1529_v26, %v1544_v54  ;;  %vm4707_vm12 = vcmp.lt.s32.totalorder %v2513_v1, %v2190_v29  ;;  %vm4708_vm15 = vcmp.ge.s32.totalorder %v2513_v1, %v2188_v28  ;;  %v1848_v20 = vpop.f32.mrb[8].mxu1 }
 0x24a   :  { %vm3009_vm5 = vmand %vm4708_vm15, %vm4707_vm12  ;;  %vm4711_vm4 = vcmp.lt.s32.totalorder %v2513_v1, %v2194_v31  ;;  %vm4712_vm1 = vcmp.ge.s32.totalorder %v2513_v1, %v2192_v30  ;;  %vm4715_vm0 = vcmp.lt.s32.totalorder %v2513_v1, %v2198_v34  ;;  %vm4716_vm13 = vcmp.ge.s32.totalorder %v2513_v1, %v2196_v33  ;;  %v487_v52 = vpop.f32.mrb[9].mxu1 }
 0x24b   :  { %vm3019_vm9 = vmand %vm4712_vm1, %vm4711_vm4  ;;  %v638_v54 = vsel %vm2715_vm7, %v2841_v48, 0.0  ;;  %v765_v45 = vsel %vm2725_vm10, %v2841_v48, 0.0  ;;  %v892_v7 = vsel %vm2735_vm6, %v2841_v48, 0.0  ;;  %v1019_v57 = vsel %vm2761_vm11, %v2841_v48, 0.0 }
 0x24c   :  { %vm3029_vm12 = vmand %vm4716_vm13, %vm4715_vm0  ;;  %vm4719_vm13 = vcmp.lt.s32.totalorder %v2513_v1, %v2202_v36  ;;  %vm4720_vm0 = vcmp.ge.s32.totalorder %v2513_v1, %v2200_v35  ;;  %v656_v53 = vmax.f32 %v638_v54, %v653_v8  ;;  %v783_v55 = vmax.f32 %v765_v45, %v780_v9 }
 0x24d   :  { %vm3055_vm4 = vmand %vm4720_vm0, %vm4719_vm13  ;;  %v910_v58 = vmax.f32 %v892_v7, %v907_v10  ;;  %v1037_v16 = vmax.f32 %v1019_v57, %v1034_v15  ;;  %vm4723_vm11 = vcmp.lt.s32.totalorder %v2513_v1, %v2214_v38  ;;  %vm4724_vm6 = vcmp.ge.s32.totalorder %v2513_v1, %v2212_v37  ;;  %v1849_v10 = vpop.f32.mrb[10].mxu1 }
 0x24e   :  { %vm3069_vm1 = vmand %vm4724_vm6, %vm4723_vm11  ;;  %vm4727_vm13 = vcmp.lt.s32.totalorder %v2513_v1, %v2218_v40  ;;  %vm4728_vm0 = vcmp.ge.s32.totalorder %v2513_v1, %v2216_v39  ;;  %v4729_v8 = vmov 0  ;;  %vm4731_vm10 = vcmp.lt.s32.totalorder %v2513_v1, %v2222_v42 }
 0x24f   :  { %vm3079_vm7 = vmand %vm4728_vm0, %vm4727_vm13  ;;  %vm4732_vm15 = vcmp.ge.s32.totalorder %v2513_v1, %v2220_v41  ;;  %v4733_v9 = vmov 0  ;;  %vm4735_vm13 = vnez %v4652_v27  ;;  %vm4736_vm0 = vnez %v4660_v61 }
 0x250   :  { %v4730_v8 = vsel %vm3079_vm7, 4294967295, %v4729_v8  ;;  %vm3089_vm11 = vmand %vm4732_vm15, %vm4731_vm10  ;;  %v1146_v15 = vsel %vm4735_vm13, %v2841_v48, 0.0  ;;  %v1273_v54 = vsel %vm4736_vm0, %v2841_v48, 0.0  ;;  %vm4737_vm15 = vnez %v4664_v6 }
 0x251   :  { %v4734_v9 = vsel %vm3089_vm11, 4294967295, %v4733_v9  ;;  %v1400_v45 = vsel %vm4737_vm15, %v2841_v48, 0.0  ;;  %vm4738_vm10 = vnez %v4668_v49  ;;  %vm4739_vm6 = vcmp.lt.s32.totalorder %v2513_v1, %v2226_v44 }
 0x252   :  { %v1527_v7 = vsel %vm4738_vm10, %v2841_v48, 0.0  ;;  %vm4740_vm8 = vcmp.ge.s32.totalorder %v2513_v1, %v2224_v43  ;;  %v4741_v27 = vmov 0  ;;  %v490_v1 = vpop.f32.mrb[11].mxu1  ;;  %v1164_v61 = vmax.f32 %v1146_v15, %v1161_v22 }
 0x253   :  { %vm3115_vm11 = vmand %vm4740_vm8, %vm4739_vm6  ;;  %v1291_v6 = vmax.f32 %v1273_v54, %v1288_v23  ;;  %v1418_v48 = vmax.f32 %v1400_v45, %v1415_v24  ;;  %v1545_v49 = vmax.f32 %v1527_v7, %v1542_v47  ;;  %vm4743_vm6 = vcmp.lt.s32.totalorder %v2539_v5, %v2190_v29 }
 0x254   :  { %v4742_v27 = vsel %vm3115_vm11, 4294967295, %v4741_v27  ;;  %vm4744_vm15 = vcmp.ge.s32.totalorder %v2539_v5, %v2188_v28  ;;  %v4745_v57 = vmov 0  ;;  %vm4747_vm7 = vcmp.lt.s32.totalorder %v2539_v5, %v2194_v31 }
 0x255   :  { %vm3137_vm13 = vmand %vm4744_vm15, %vm4743_vm6  ;;  %vm4748_vm8 = vcmp.ge.s32.totalorder %v2539_v5, %v2192_v30  ;;  %v4749_v22 = vmov 0  ;;  %vm4751_vm0 = vcmp.lt.s32.totalorder %v2539_v5, %v2198_v34  ;;  %vm4752_vm11 = vcmp.ge.s32.totalorder %v2539_v5, %v2196_v33 }
 0x256   :  { %v4746_v57 = vsel %vm3137_vm13, 4294967295, %v4745_v57  ;;  %vm3147_vm10 = vmand %vm4748_vm8, %vm4747_vm7  ;;  %v4753_v23 = vmov 0  ;;  %v524_v24 = vmax.f32 %v2872_v50, 0.0  ;;  %v3167_v47 = vmax.f32 %v2905_v63, 0.0 }
 0x257   :  { %v4750_v22 = vsel %vm3147_vm10, 4294967295, %v4749_v22  ;;  %vm3157_vm15 = vmand %vm4752_vm11, %vm4751_vm0  ;;  %v3170_v15 = vmax.f32 %v2908_v2, 0.0  ;;  %vm4755_vm7 = vcmp.lt.s32.totalorder %v2539_v5, %v2202_v36  ;;  %vm4756_vm11 = vcmp.ge.s32.totalorder %v2539_v5, %v2200_v35 }
 0x258   :  { %v4754_v23 = vsel %vm3157_vm15, 4294967295, %v4753_v23  ;;  %vm3178_vm0 = vmand %vm4756_vm11, %vm4755_vm7  ;;  %v4757_v54 = vmov 0  ;;  %v3183_v45 = vmax.f32 %v2915_v3, 0.0  ;;  %vm4761_vm8 = vcmp.ge.s32.totalorder %v2539_v5, %v2212_v37 }
 0x259   :  { %v4758_v54 = vsel %vm3178_vm0, 4294967295, %v4757_v54  ;;  %vm4760_vm0 = vcmp.lt.s32.totalorder %v2539_v5, %v2214_v38  ;;  %v4762_v50 = vmov 0  ;;  %vm4765_vm13 = vcmp.lt.s32.totalorder %v2539_v5, %v2218_v40 }
 0x25a   :  { %4759 = vst [vmem:[#allocation25_spill] sm:$0xff] %v3183_v45  ;;  %vm3203_vm10 = vmand %vm4761_vm8, %vm4760_vm0  ;;  %vm4766_vm15 = vcmp.ge.s32.totalorder %v2539_v5, %v2216_v39  ;;  %v4767_v63 = vmov 0  ;;  %vm4770_vm11 = vcmp.lt.s32.totalorder %v2539_v5, %v2222_v42  ;;  %vm4771_vm6 = vcmp.ge.s32.totalorder %v2539_v5, %v2220_v41 }
 0x25b   :  { %v4763_v50 = vsel %vm3203_vm10, 4294967295, %v4762_v50  ;;  %vm3213_vm7 = vmand %vm4766_vm15, %vm4765_vm13  ;;  %v4772_v2 = vmov 0  ;;  %v3228_v3 = vadd.f32 %v1848_v20, %v2458_v60  ;;  %v3235_v7 = vadd.f32 %v2458_v60, %v487_v52 }
 0x25c   :  { %4764 = vst [vmem:[#allocation26_spill] sm:$0xff] %v4763_v50  ;;  %v4768_v63 = vsel %vm3213_vm7, 4294967295, %v4767_v63  ;;  %vm3223_vm0 = vmand %vm4771_vm6, %vm4770_vm11  ;;  %v3238_v45 = vadd.f32 %v1849_v10, %v2458_v60  ;;  %vm4776_vm15 = vnez %v4674_v14  ;;  %vm4777_vm6 = vnez %v4678_v32 }
 0x25d   :  { %4769 = vst [vmem:[#allocation27_spill] sm:$0xff] %v4768_v63  ;;  %v4773_v2 = vsel %vm3223_vm0, 4294967295, %v4772_v2  ;;  %4775 = vst [vmem:[#allocation29_spill] sm:$0xff] %v3228_v3  ;;  %v3241_v63 = vadd.f32 %v2458_v60, %v490_v1  ;;  %v770_v20 = vsel %vm4777_vm6, %v524_v24, 0.0  ;;  %vm4778_vm11 = vnez %v4682_v19 }
 0x25e   :  { %4774 = vst [vmem:[#allocation28_spill] sm:$0xff] %v4773_v2  ;;  %v643_v2 = vsel %vm4776_vm15, %v524_v24, 0.0  ;;  %v897_v3 = vsel %vm4778_vm11, %v524_v24, 0.0  ;;  %vm4779_vm8 = vnez %v4690_v46  ;;  %vm4780_vm13 = vcmp.lt.s32.totalorder %v2539_v5, %v2226_v44 }
 0x25f   :  { %v1024_v50 = vsel %vm4779_vm8, %v524_v24, 0.0  ;;  %vm4781_vm0 = vcmp.ge.s32.totalorder %v2539_v5, %v2224_v43  ;;  %v4782_v52 = vmov 0  ;;  %v654_v5 = vmax.f32 %v643_v2, %v656_v53 }
 0x260   :  { %vm3257_vm7 = vmand %vm4781_vm0, %vm4780_vm13  ;;  %v781_v14 = vmax.f32 %v770_v20, %v783_v55  ;;  %v908_v32 = vmax.f32 %v897_v3, %v910_v58  ;;  %v1035_v19 = vmax.f32 %v1024_v50, %v1037_v16  ;;  %vm4784_vm13 = vcmp.lt.s32.totalorder %v2577_v11, %v2190_v29  ;;  %v3307_v58 = vpop.f32.mrb[12].mxu1 }
 0x261   :  { %v4783_v52 = vsel %vm3257_vm7, 4294967295, %v4782_v52  ;;  %vm4785_vm15 = vcmp.ge.s32.totalorder %v2577_v11, %v2188_v28  ;;  %v4786_v46 = vmov 0  ;;  %vm4788_vm10 = vcmp.lt.s32.totalorder %v2577_v11, %v2194_v31 }
 0x262   :  { %vm3279_vm11 = vmand %vm4785_vm15, %vm4784_vm13  ;;  %vm4789_vm0 = vcmp.ge.s32.totalorder %v2577_v11, %v2192_v30  ;;  %vm4792_vm6 = vcmp.lt.s32.totalorder %v2577_v11, %v2198_v34  ;;  %vm4793_vm7 = vcmp.ge.s32.totalorder %v2577_v11, %v2196_v33  ;;  %v1278_v10 = vsel %vm2963_vm3, %v524_v24, 0.0 }
 0x263   :  { %v4787_v46 = vsel %vm3279_vm11, 4294967295, %v4786_v46  ;;  %vm3289_vm8 = vmand %vm4789_vm0, %vm4788_vm10  ;;  %vm4796_vm10 = vnez %v4694_v21  ;;  %v1405_v1 = vsel %vm2973_vm14, %v524_v24, 0.0  ;;  %v1532_v50 = vsel %vm2995_vm2, %v524_v24, 0.0  ;;  %v3339_v21 = vpop.f32.mrb[13].mxu1 }
 0x264   :  { %vm3299_vm15 = vmand %vm4793_vm7, %vm4792_vm6  ;;  %v1151_v16 = vsel %vm4796_vm10, %v524_v24, 0.0  ;;  %vm4797_vm7 = vcmp.lt.s32.totalorder %v2577_v11, %v2202_v36  ;;  %vm4798_vm6 = vcmp.ge.s32.totalorder %v2577_v11, %v2200_v35  ;;  %v1289_v56 = vmax.f32 %v1278_v10, %v1291_v6 }
 0x265   :  { %vm3323_vm0 = vmand %vm4798_vm6, %vm4797_vm7  ;;  %v1162_v25 = vmax.f32 %v1151_v16, %v1164_v61  ;;  %v1416_v62 = vmax.f32 %v1405_v1, %v1418_v48  ;;  %v1543_v24 = vmax.f32 %v1532_v50, %v1545_v49  ;;  %vm4801_vm6 = vcmp.lt.s32.totalorder %v2577_v11, %v2214_v38  ;;  %v3355_v61 = vpop.f32.mrb[14].mxu1 }
 0x266   :  { %vm4802_vm14 = vcmp.ge.s32.totalorder %v2577_v11, %v2212_v37  ;;  %v641_v6 = vsel %vm3009_vm5, %v3167_v47, 0.0  ;;  %v768_v48 = vsel %vm3019_vm9, %v3167_v47, 0.0  ;;  %v895_v49 = vsel %vm3029_vm12, %v3167_v47, 0.0  ;;  %v3391_v0 = vpop.f32.mrb[15].mxu1 }
 0x267   :  { %vm3347_vm10 = vmand %vm4802_vm14, %vm4801_vm6  ;;  %v1022_v20 = vsel %vm3055_vm4, %v3167_v47, 0.0  ;;  %vm4805_vm14 = vcmp.lt.s32.totalorder %v2577_v11, %v2218_v40  ;;  %vm4806_vm6 = vcmp.ge.s32.totalorder %v2577_v11, %v2216_v39  ;;  %v659_v4 = vmax.f32 %v641_v6, %v654_v5 }
 0x268   :  { %vm3375_vm13 = vmand %vm4806_vm6, %vm4805_vm14  ;;  %v786_v51 = vmax.f32 %v768_v48, %v781_v14  ;;  %v913_v16 = vmax.f32 %v895_v49, %v908_v32  ;;  %v1040_v10 = vmax.f32 %v1022_v20, %v1035_v19  ;;  %vm4809_vm6 = vcmp.lt.s32.totalorder %v2577_v11, %v2222_v42 }
 0x269   :  { %vm4810_vm12 = vcmp.ge.s32.totalorder %v2577_v11, %v2220_v41  ;;  %v1149_v5 = vsel %vm3069_vm1, %v3167_v47, 0.0  ;;  %vm4813_vm4 = vnez %v4730_v8  ;;  %vm4816_vm7 = vcmp.lt.s32.totalorder %v2577_v11, %v2226_v44 }
 0x26a   :  { %vm3399_vm9 = vmand %vm4810_vm12, %vm4809_vm6  ;;  %v1276_v14 = vsel %vm4813_vm4, %v3167_v47, 0.0  ;;  %vm4814_vm12 = vnez %v4734_v9  ;;  %vm4815_vm6 = vnez %v4742_v27  ;;  %vm4817_vm14 = vcmp.ge.s32.totalorder %v2577_v11, %v2224_v43 }
 0x26b   :  { %v1403_v32 = vsel %vm4814_vm12, %v3167_v47, 0.0  ;;  %v1530_v19 = vsel %vm4815_vm6, %v3167_v47, 0.0  ;;  %vm3425_vm5 = vmand %vm4817_vm14, %vm4816_vm7  ;;  %v1167_v11 = vmax.f32 %v1149_v5, %v1162_v25  ;;  %v1294_v8 = vmax.f32 %v1276_v14, %v1289_v56  ;;  %v4856_v14 = vld [vmem:[#allocation28_spill] sm:$0xff] }
 0x26c   :  { %v1421_v9 = vmax.f32 %v1403_v32, %v1416_v62  ;;  %v1548_v27 = vmax.f32 %v1530_v19, %v1543_v24  ;;  %vm4820_vm14 = vcmp.lt.s32.totalorder %v2580_v12, %v2190_v29  ;;  %vm4821_vm1 = vcmp.ge.s32.totalorder %v2580_v12, %v2188_v28 }
 0x26d   :  { %vm3447_vm12 = vmand %vm4821_vm1, %vm4820_vm14  ;;  %vm4824_vm2 = vcmp.lt.s32.totalorder %v2580_v12, %v2194_v31  ;;  %vm4825_vm7 = vcmp.ge.s32.totalorder %v2580_v12, %v2192_v30  ;;  %v4826_v50 = vmov 0  ;;  %vm4828_vm4 = vcmp.lt.s32.totalorder %v2580_v12, %v2198_v34 }
 0x26e   :  { %vm3457_vm6 = vmand %vm4825_vm7, %vm4824_vm2  ;;  %vm4829_vm3 = vcmp.ge.s32.totalorder %v2580_v12, %v2196_v33  ;;  %v4830_v25 = vmov 0  ;;  %vm4832_vm2 = vnez %v4746_v57  ;;  %vm4833_vm7 = vnez %v4750_v22 }
 0x26f   :  { %v4827_v50 = vsel %vm3457_vm6, 4294967295, %v4826_v50  ;;  %vm3467_vm1 = vmand %vm4829_vm3, %vm4828_vm4  ;;  %v644_v56 = vsel %vm4832_vm2, %v3170_v15, 0.0  ;;  %v771_v62 = vsel %vm4833_vm7, %v3170_v15, 0.0  ;;  %vm4834_vm3 = vnez %v4754_v23 }
 0x270   :  { %v4831_v25 = vsel %vm3467_vm1, 4294967295, %v4830_v25  ;;  %v898_v24 = vsel %vm4834_vm3, %v3170_v15, 0.0  ;;  %vm4835_vm4 = vnez %v4758_v54  ;;  %vm4836_vm14 = vcmp.lt.s32.totalorder %v2580_v12, %v2202_v36 }
 0x271   :  { %v1025_v6 = vsel %vm4835_vm4, %v3170_v15, 0.0  ;;  %vm4837_vm11 = vcmp.ge.s32.totalorder %v2580_v12, %v2200_v35  ;;  %v4838_v57 = vmov 0  ;;  %v657_v22 = vmax.f32 %v644_v56, %v659_v4 }
 0x272   :  { %vm3493_vm1 = vmand %vm4837_vm11, %vm4836_vm14  ;;  %v784_v23 = vmax.f32 %v771_v62, %v786_v51  ;;  %v911_v54 = vmax.f32 %v898_v24, %v913_v16  ;;  %v1038_v48 = vmax.f32 %v1025_v6, %v1040_v10  ;;  %vm4840_vm14 = vcmp.lt.s32.totalorder %v2580_v12, %v2214_v38  ;;  %v4852_v51 = vld [vmem:[#allocation26_spill] sm:$0xff]  ;;  %v4854_v10 = vld [vmem:[#allocation27_spill] sm:$0xff] }
 0x273   :  { %v4839_v57 = vsel %vm3493_vm1, 4294967295, %v4838_v57  ;;  %vm4841_vm2 = vcmp.ge.s32.totalorder %v2580_v12, %v2212_v37  ;;  %v4842_v49 = vmov 0  ;;  %vm4844_vm6 = vcmp.lt.s32.totalorder %v2580_v12, %v2218_v40 }
 0x274   :  { %vm3515_vm3 = vmand %vm4841_vm2, %vm4840_vm14  ;;  %vm4845_vm11 = vcmp.ge.s32.totalorder %v2580_v12, %v2216_v39  ;;  %v4846_v20 = vmov 0  ;;  %vm4848_vm7 = vcmp.lt.s32.totalorder %v2580_v12, %v2222_v42  ;;  %vm4849_vm1 = vcmp.ge.s32.totalorder %v2580_v12, %v2220_v41 }
 0x275   :  { %v4843_v49 = vsel %vm3515_vm3, 4294967295, %v4842_v49  ;;  %vm3525_vm4 = vmand %vm4845_vm11, %vm4844_vm6  ;;  %v4850_v4 = vmov 0  ;;  %vm4853_vm6 = vnez %v4852_v51  ;;  %vm4855_vm11 = vnez %v4854_v10 }
 0x276   :  { %v4847_v20 = vsel %vm3525_vm4, 4294967295, %v4846_v20  ;;  %vm3535_vm2 = vmand %vm4849_vm1, %vm4848_vm7  ;;  %v1152_v16 = vsel %vm4853_vm6, %v3170_v15, 0.0  ;;  %v1279_v5 = vsel %vm4855_vm11, %v3170_v15, 0.0  ;;  %vm4857_vm1 = vnez %v4856_v14 }
 0x277   :  { %v4851_v4 = vsel %vm3535_vm2, 4294967295, %v4850_v4  ;;  %v1406_v32 = vsel %vm4857_vm1, %v3170_v15, 0.0  ;;  %vm4858_vm7 = vnez %v4783_v52  ;;  %vm4859_vm14 = vcmp.lt.s32.totalorder %v2580_v12, %v2226_v44 }
 0x278   :  { %v1533_v19 = vsel %vm4858_vm7, %v3170_v15, 0.0  ;;  %vm4860_vm3 = vcmp.ge.s32.totalorder %v2580_v12, %v2224_v43  ;;  %v4861_v56 = vmov 0  ;;  %v1165_v62 = vmax.f32 %v1152_v16, %v1167_v11  ;;  %v4965_v11 = vld [vmem:[#allocation23_spill] sm:$0xff] }
 0x279   :  { %vm3561_vm2 = vmand %vm4860_vm3, %vm4859_vm14  ;;  %v1292_v24 = vmax.f32 %v1279_v5, %v1294_v8  ;;  %v1419_v52 = vmax.f32 %v1406_v32, %v1421_v9  ;;  %v1546_v15 = vmax.f32 %v1533_v19, %v1548_v27  ;;  %vm4863_vm1 = vcmp.lt.s32.totalorder %v2583_v13, %v2190_v29  ;;  %v4875_v9 = vld [vmem:[#allocation25_spill] sm:$0xff] }
 0x27a   :  { %v4862_v56 = vsel %vm3561_vm2, 4294967295, %v4861_v56  ;;  %vm4864_vm7 = vcmp.ge.s32.totalorder %v2583_v13, %v2188_v28  ;;  %v4865_v12 = vmov 0  ;;  %vm4867_vm14 = vcmp.lt.s32.totalorder %v2583_v13, %v2194_v31 }
 0x27b   :  { %vm3575_vm3 = vmand %vm4864_vm7, %vm4863_vm1  ;;  %vm4868_vm6 = vcmp.ge.s32.totalorder %v2583_v13, %v2192_v30  ;;  %vm4871_vm2 = vcmp.lt.s32.totalorder %v2583_v13, %v2198_v34  ;;  %vm4872_vm4 = vcmp.ge.s32.totalorder %v2583_v13, %v2196_v33  ;;  %v769_v6 = vsel %vm3289_vm8, %v4875_v9, 0.0 }
 0x27c   :  { %v4866_v12 = vsel %vm3575_vm3, 4294967295, %v4865_v12  ;;  %vm3585_vm11 = vmand %vm4868_vm6, %vm4867_vm14  ;;  %vm4876_vm6 = vnez %v4787_v46  ;;  %v896_v51 = vsel %vm3299_vm15, %v4875_v9, 0.0  ;;  %v1023_v16 = vsel %vm3323_vm0, %v4875_v9, 0.0 }
 0x27d   :  { %vm3595_vm1 = vmand %vm4872_vm4, %vm4871_vm2  ;;  %v642_v27 = vsel %vm4876_vm6, %v4875_v9, 0.0  ;;  %vm4877_vm4 = vcmp.lt.s32.totalorder %v2583_v13, %v2202_v36  ;;  %vm4878_vm2 = vcmp.ge.s32.totalorder %v2583_v13, %v2200_v35  ;;  %v787_v55 = vmax.f32 %v769_v6, %v784_v23 }
 0x27e   :  { %vm3621_vm14 = vmand %vm4878_vm2, %vm4877_vm4  ;;  %v660_v53 = vmax.f32 %v642_v27, %v657_v22  ;;  %v914_v2 = vmax.f32 %v896_v51, %v911_v54  ;;  %v1041_v10 = vmax.f32 %v1023_v16, %v1038_v48  ;;  %vm4881_vm0 = vcmp.lt.s32.totalorder %v2583_v13, %v2214_v38 }
 0x27f   :  { %vm4882_vm6 = vcmp.ge.s32.totalorder %v2583_v13, %v2212_v37  ;;  %v4883_v5 = vmov 0  ;;  %vm4885_vm2 = vcmp.lt.s32.totalorder %v2583_v13, %v2218_v40  ;;  %vm4886_vm8 = vcmp.ge.s32.totalorder %v2583_v13, %v2216_v39 }
 0x280   :  { %vm3635_vm4 = vmand %vm4882_vm6, %vm4881_vm0  ;;  %vm4889_vm7 = vcmp.lt.s32.totalorder %v2583_v13, %v2222_v42  ;;  %vm4890_vm3 = vcmp.ge.s32.totalorder %v2583_v13, %v2220_v41  ;;  %v1150_v54 = vsel %vm3347_vm10, %v4875_v9, 0.0  ;;  %v1277_v48 = vsel %vm3375_vm13, %v4875_v9, 0.0 }
 0x281   :  { %v4884_v5 = vsel %vm3635_vm4, 4294967295, %v4883_v5  ;;  %vm3645_vm15 = vmand %vm4886_vm8, %vm4885_vm2  ;;  %v1404_v14 = vsel %vm3399_vm9, %v4875_v9, 0.0  ;;  %v1531_v32 = vsel %vm3425_vm5, %v4875_v9, 0.0  ;;  %v1295_v1 = vmax.f32 %v1277_v48, %v1292_v24 }
 0x282   :  { %vm3655_vm0 = vmand %vm4890_vm3, %vm4889_vm7  ;;  %vm4893_vm3 = vcmp.lt.s32.totalorder %v2583_v13, %v2226_v44  ;;  %vm4894_vm7 = vcmp.ge.s32.totalorder %v2583_v13, %v2224_v43  ;;  %v1168_v13 = vmax.f32 %v1150_v54, %v1165_v62  ;;  %v1422_v26 = vmax.f32 %v1404_v14, %v1419_v52  ;;  %v4910_v52 = vld [vmem:[#allocation29_spill] sm:$0xff] }
 0x283   :  { %vm3681_vm8 = vmand %vm4894_vm7, %vm4893_vm3  ;;  %v1549_v19 = vmax.f32 %v1531_v32, %v1546_v15  ;;  %vm4898_vm7 = vcmp.lt.s32.totalorder %v2610_v17, %v2190_v29  ;;  %vm4899_vm13 = vcmp.ge.s32.totalorder %v2610_v17, %v2188_v28  ;;  %vm4902_vm2 = vcmp.lt.s32.totalorder %v2610_v17, %v2194_v31 }
 0x284   :  { %vm3703_vm9 = vmand %vm4899_vm13, %vm4898_vm7  ;;  %vm4903_vm3 = vcmp.ge.s32.totalorder %v2610_v17, %v2192_v30  ;;  %v4904_v62 = vmov 0  ;;  %vm4906_vm10 = vcmp.lt.s32.totalorder %v2610_v17, %v2198_v34  ;;  %vm4907_vm6 = vcmp.ge.s32.totalorder %v2610_v17, %v2196_v33 }
 0x285   :  { %vm3713_vm5 = vmand %vm4903_vm3, %vm4902_vm2  ;;  %v4908_v24 = vmov 0  ;;  %v528_v15 = vmax.f32 %v4910_v52, 0.0  ;;  %v3733_v27 = vmax.f32 %v3235_v7, 0.0  ;;  %v3736_v6 = vmax.f32 %v3238_v45, 0.0 }
 0x286   :  { %v4905_v62 = vsel %vm3713_vm5, 4294967295, %v4904_v62  ;;  %vm3723_vm13 = vmand %vm4907_vm6, %vm4906_vm10  ;;  %vm4911_vm6 = vcmp.lt.s32.totalorder %v2610_v17, %v2202_v36  ;;  %vm4912_vm10 = vcmp.ge.s32.totalorder %v2610_v17, %v2200_v35  ;;  %v4913_v51 = vmov 0 }
 0x287   :  { %v4909_v24 = vsel %vm3723_vm13, 4294967295, %v4908_v24  ;;  %vm3744_vm2 = vmand %vm4912_vm10, %vm4911_vm6  ;;  %v3749_v16 = vmax.f32 %v3241_v63, 0.0  ;;  %vm4916_vm3 = vcmp.ge.s32.totalorder %v2610_v17, %v2212_v37  ;;  %vm4919_vm4 = vcmp.lt.s32.totalorder %v2610_v17, %v2218_v40 }
 0x288   :  { %v4914_v51 = vsel %vm3744_vm2, 4294967295, %v4913_v51  ;;  %vm4915_vm2 = vcmp.lt.s32.totalorder %v2610_v17, %v2214_v38  ;;  %vm4920_vm13 = vcmp.ge.s32.totalorder %v2610_v17, %v2216_v39  ;;  %v4921_v63 = vmov 0 }
 0x289   :  { %vm3769_vm5 = vmand %vm4916_vm3, %vm4915_vm2  ;;  %vm4923_vm10 = vcmp.lt.s32.totalorder %v2610_v17, %v2222_v42  ;;  %vm4924_vm7 = vcmp.ge.s32.totalorder %v2610_v17, %v2220_v41  ;;  %v4925_v7 = vmov 0  ;;  %v3795_v54 = vadd.f32 %v3307_v58, %v2458_v60 }
 0x28a   :  { %vm3779_vm6 = vmand %vm4920_vm13, %vm4919_vm4  ;;  %v3803_v48 = vadd.f32 %v2458_v60, %v3339_v21  ;;  %v3807_v14 = vadd.f32 %v3355_v61, %v2458_v60  ;;  %v3811_v32 = vadd.f32 %v2458_v60, %v3391_v0  ;;  %v647_v58 = vsel %vm3447_vm12, %v528_v15, 0.0  ;;  %v4935_v61 = vld [vmem:[#allocation22_spill] sm:$0xff] }
 0x28b   :  { %v4922_v63 = vsel %vm3779_vm6, 4294967295, %v4921_v63  ;;  %vm3789_vm2 = vmand %vm4924_vm7, %vm4923_vm10  ;;  %4927 = vst [vmem:[#allocation26_spill] sm:$0xff] %v3795_v54  ;;  %vm4928_vm7 = vnez %v4827_v50  ;;  %vm4929_vm3 = vnez %v4831_v25  ;;  %vm4930_vm10 = vnez %v4839_v57 }
 0x28c   :  { %v4926_v7 = vsel %vm3789_vm2, 4294967295, %v4925_v7  ;;  %v774_v52 = vsel %vm4928_vm7, %v528_v15, 0.0  ;;  %v901_v54 = vsel %vm4929_vm3, %v528_v15, 0.0  ;;  %v1028_v21 = vsel %vm4930_vm10, %v528_v15, 0.0 }
 0x28d   :  { %vm4931_vm4 = vcmp.lt.s32.totalorder %v2610_v17, %v2226_v44  ;;  %vm4932_vm13 = vcmp.ge.s32.totalorder %v2610_v17, %v2224_v43  ;;  %v4933_v60 = vmov 0  ;;  %v658_v17 = vmax.f32 %v647_v58, %v660_v53 }
 0x28e   :  { %vm3827_vm2 = vmand %vm4932_vm13, %vm4931_vm4  ;;  %v785_v0 = vmax.f32 %v774_v52, %v787_v55  ;;  %v912_v47 = vmax.f32 %v901_v54, %v914_v2  ;;  %v1039_v50 = vmax.f32 %v1028_v21, %v1041_v10  ;;  %vm4936_vm13 = vcmp.lt.s32.totalorder %v2613_v18, %v2190_v29 }
 0x28f   :  { %v4934_v60 = vsel %vm3827_vm2, 4294967295, %v4933_v60  ;;  %vm4937_vm12 = vcmp.ge.s32.totalorder %v2613_v18, %v2188_v28  ;;  %v4938_v25 = vmov 0  ;;  %vm4940_vm6 = vcmp.lt.s32.totalorder %v2613_v18, %v2194_v31 }
 0x290   :  { %vm3849_vm3 = vmand %vm4937_vm12, %vm4936_vm13  ;;  %vm4941_vm4 = vcmp.ge.s32.totalorder %v2613_v18, %v2192_v30  ;;  %v4942_v57 = vmov 0  ;;  %vm4944_vm7 = vcmp.lt.s32.totalorder %v2613_v18, %v2198_v34  ;;  %vm4945_vm2 = vcmp.ge.s32.totalorder %v2613_v18, %v2196_v33 }
 0x291   :  { %v4939_v25 = vsel %vm3849_vm3, 4294967295, %v4938_v25  ;;  %vm3859_vm10 = vmand %vm4941_vm4, %vm4940_vm6  ;;  %v4946_v53 = vmov 0  ;;  %vm4948_vm6 = vnez %v4843_v49  ;;  %vm4949_vm4 = vnez %v4847_v20 }
 0x292   :  { %v4943_v57 = vsel %vm3859_vm10, 4294967295, %v4942_v57  ;;  %vm3869_vm12 = vmand %vm4945_vm2, %vm4944_vm7  ;;  %v1155_v55 = vsel %vm4948_vm6, %v528_v15, 0.0  ;;  %v1282_v2 = vsel %vm4949_vm4, %v528_v15, 0.0  ;;  %vm4950_vm10 = vnez %v4851_v4 }
 0x293   :  { %v4947_v53 = vsel %vm3869_vm12, 4294967295, %v4946_v53  ;;  %v1409_v10 = vsel %vm4950_vm10, %v528_v15, 0.0  ;;  %vm4951_vm2 = vnez %v4862_v56  ;;  %vm4952_vm7 = vcmp.lt.s32.totalorder %v2613_v18, %v2202_v36 }
 0x294   :  { %v1536_v54 = vsel %vm4951_vm2, %v528_v15, 0.0  ;;  %vm4953_vm13 = vcmp.ge.s32.totalorder %v2613_v18, %v2200_v35  ;;  %v1166_v49 = vmax.f32 %v1155_v55, %v1168_v13  ;;  %v1293_v20 = vmax.f32 %v1282_v2, %v1295_v1 }
 0x295   :  { %vm3891_vm12 = vmand %vm4953_vm13, %vm4952_vm7  ;;  %v1420_v4 = vmax.f32 %v1409_v10, %v1422_v26  ;;  %v1547_v56 = vmax.f32 %v1536_v54, %v1549_v19  ;;  %vm4956_vm7 = vcmp.lt.s32.totalorder %v2613_v18, %v2214_v38  ;;  %vm4957_vm6 = vcmp.ge.s32.totalorder %v2613_v18, %v2212_v37 }
 0x296   :  { %vm3913_vm10 = vmand %vm4957_vm6, %vm4956_vm7  ;;  %vm4960_vm2 = vnez %v4866_v12  ;;  %v772_v1 = vsel %vm3585_vm11, %v3733_v27, 0.0  ;;  %v899_v26 = vsel %vm3595_vm1, %v3733_v27, 0.0  ;;  %v1026_v19 = vsel %vm3621_vm14, %v3733_v27, 0.0 }
 0x297   :  { %v645_v13 = vsel %vm4960_vm2, %v3733_v27, 0.0  ;;  %vm4961_vm6 = vcmp.lt.s32.totalorder %v2613_v18, %v2218_v40  ;;  %vm4962_vm7 = vcmp.ge.s32.totalorder %v2613_v18, %v2216_v39  ;;  %v790_v46 = vmax.f32 %v772_v1, %v785_v0 }
 0x298   :  { %vm3939_vm3 = vmand %vm4962_vm7, %vm4961_vm6  ;;  %v663_v8 = vmax.f32 %v645_v13, %v658_v17  ;;  %v917_v52 = vmax.f32 %v899_v26, %v912_v47  ;;  %v1044_v21 = vmax.f32 %v1026_v19, %v1039_v50  ;;  %vm4966_vm6 = vcmp.lt.s32.totalorder %v2613_v18, %v2222_v42 }
 0x299   :  { %vm4967_vm7 = vcmp.ge.s32.totalorder %v2613_v18, %v2220_v41  ;;  %vm4970_vm1 = vnez %v4884_v5  ;;  %v1280_v0 = vsel %vm3645_vm15, %v3733_v27, 0.0  ;;  %v1407_v47 = vsel %vm3655_vm0, %v3733_v27, 0.0 }
 0x29a   :  { %vm3957_vm11 = vmand %vm4967_vm7, %vm4966_vm6  ;;  %v1153_v17 = vsel %vm4970_vm1, %v3733_v27, 0.0  ;;  %v1534_v50 = vsel %vm3681_vm8, %v3733_v27, 0.0  ;;  %vm4971_vm6 = vcmp.lt.s32.totalorder %v2613_v18, %v2226_v44  ;;  %vm4972_vm7 = vcmp.ge.s32.totalorder %v2613_v18, %v2224_v43 }
 0x29b   :  { %vm3983_vm2 = vmand %vm4972_vm7, %vm4971_vm6  ;;  %v1171_v22 = vmax.f32 %v1153_v17, %v1166_v49  ;;  %v1298_v23 = vmax.f32 %v1280_v0, %v1293_v20  ;;  %v1425_v3 = vmax.f32 %v1407_v47, %v1420_v4  ;;  %v1552_v27 = vmax.f32 %v1534_v50, %v1547_v56  ;;  %v5025_v0 = vld [vmem:[#allocation24_spill] sm:$0xff] }
 0x29c   :  { %vm4975_vm8 = vcmp.lt.s32.totalorder %v4897_v59, %v2190_v29  ;;  %vm4976_vm1 = vcmp.ge.s32.totalorder %v4897_v59, %v2188_v28  ;;  %vm4979_vm7 = vcmp.lt.s32.totalorder %v4897_v59, %v2194_v31  ;;  %vm4980_vm15 = vcmp.ge.s32.totalorder %v4897_v59, %v2192_v30 }
 0x29d   :  { %vm3997_vm6 = vmand %vm4976_vm1, %vm4975_vm8  ;;  %vm4983_vm14 = vcmp.lt.s32.totalorder %v4897_v59, %v2198_v34  ;;  %vm4984_vm13 = vcmp.ge.s32.totalorder %v4897_v59, %v2196_v33  ;;  %v4985_v10 = vmov 0  ;;  %v648_v54 = vsel %vm3703_vm9, %v3736_v6, 0.0 }
 0x29e   :  { %vm4007_vm0 = vmand %vm4980_vm15, %vm4979_vm7  ;;  %vm4987_vm15 = vnez %v4905_v62  ;;  %vm4990_vm7 = vcmp.lt.s32.totalorder %v4897_v59, %v2202_v36  ;;  %vm4991_vm1 = vcmp.ge.s32.totalorder %v4897_v59, %v2200_v35  ;;  %v4992_v9 = vmov 0 }
 0x29f   :  { %vm4017_vm8 = vmand %vm4984_vm13, %vm4983_vm14  ;;  %v775_v49 = vsel %vm4987_vm15, %v3736_v6, 0.0  ;;  %vm4988_vm13 = vnez %v4909_v24  ;;  %vm4989_vm14 = vnez %v4914_v51  ;;  %v661_v62 = vmax.f32 %v648_v54, %v663_v8 }
 0x2a0   :  { %v4986_v10 = vsel %vm4017_vm8, 4294967295, %v4985_v10  ;;  %v902_v20 = vsel %vm4988_vm13, %v3736_v6, 0.0  ;;  %v1029_v4 = vsel %vm4989_vm14, %v3736_v6, 0.0  ;;  %vm4043_vm4 = vmand %vm4991_vm1, %vm4990_vm7  ;;  %v788_v24 = vmax.f32 %v775_v49, %v790_v46 }
 0x2a1   :  { %v4993_v9 = vsel %vm4043_vm4, 4294967295, %v4992_v9  ;;  %v915_v51 = vmax.f32 %v902_v20, %v917_v52  ;;  %v1042_v56 = vmax.f32 %v1029_v4, %v1044_v21  ;;  %vm4994_vm13 = vcmp.lt.s32.totalorder %v4897_v59, %v2214_v38 }
 0x2a2   :  { %vm4995_vm14 = vcmp.ge.s32.totalorder %v4897_v59, %v2212_v37  ;;  %v4996_v13 = vmov 0  ;;  %vm4998_vm7 = vcmp.lt.s32.totalorder %v4897_v59, %v2218_v40  ;;  %vm4999_vm9 = vcmp.ge.s32.totalorder %v4897_v59, %v2216_v39 }
 0x2a3   :  { %vm4057_vm1 = vmand %vm4995_vm14, %vm4994_vm13  ;;  %vm5002_vm4 = vcmp.lt.s32.totalorder %v4897_v59, %v2222_v42  ;;  %vm5003_vm8 = vcmp.ge.s32.totalorder %v4897_v59, %v2220_v41  ;;  %v5004_v26 = vmov 0  ;;  %v1156_v19 = vsel %vm3769_vm5, %v3736_v6, 0.0 }
 0x2a4   :  { %v4997_v13 = vsel %vm4057_vm1, 4294967295, %v4996_v13  ;;  %vm4067_vm15 = vmand %vm4999_vm9, %vm4998_vm7  ;;  %vm5006_vm9 = vnez %v4922_v63  ;;  %vm5009_vm7 = vcmp.lt.s32.totalorder %v4897_v59, %v2226_v44  ;;  %vm5010_vm14 = vcmp.ge.s32.totalorder %v4897_v59, %v2224_v43 }
 0x2a5   :  { %vm4077_vm13 = vmand %vm5003_vm8, %vm5002_vm4  ;;  %v1283_v8 = vsel %vm5006_vm9, %v3736_v6, 0.0  ;;  %vm5007_vm4 = vnez %v4926_v7  ;;  %vm5008_vm8 = vnez %v4934_v60  ;;  %v5011_v45 = vmov 0 }
 0x2a6   :  { %v5005_v26 = vsel %vm4077_vm13, 4294967295, %v5004_v26  ;;  %v1410_v46 = vsel %vm5007_vm4, %v3736_v6, 0.0  ;;  %v1537_v52 = vsel %vm5008_vm8, %v3736_v6, 0.0  ;;  %vm4103_vm1 = vmand %vm5010_vm14, %vm5009_vm7  ;;  %v1169_v63 = vmax.f32 %v1156_v19, %v1171_v22 }
 0x2a7   :  { %v5012_v45 = vsel %vm4103_vm1, 4294967295, %v5011_v45  ;;  %v1296_v7 = vmax.f32 %v1283_v8, %v1298_v23  ;;  %v1423_v60 = vmax.f32 %v1410_v46, %v1425_v3  ;;  %v1550_v6 = vmax.f32 %v1537_v52, %v1552_v27 }
 0x2a8   :  { %vm5013_vm4 = vcmp.lt.s32.totalorder %v4935_v61, %v2190_v29  ;;  %vm5014_vm8 = vcmp.ge.s32.totalorder %v4935_v61, %v2188_v28  ;;  %v5015_v59 = vmov 0  ;;  %vm5017_vm7 = vcmp.lt.s32.totalorder %v4935_v61, %v2194_v31 }
 0x2a9   :  { %vm4117_vm14 = vmand %vm5014_vm8, %vm5013_vm4  ;;  %vm5018_vm5 = vcmp.ge.s32.totalorder %v4935_v61, %v2192_v30  ;;  %vm5021_vm1 = vcmp.lt.s32.totalorder %v4935_v61, %v2198_v34  ;;  %vm5022_vm13 = vcmp.ge.s32.totalorder %v4935_v61, %v2196_v33  ;;  %v5023_v17 = vmov 0 }
 0x2aa   :  { %v5016_v59 = vsel %vm4117_vm14, 4294967295, %v5015_v59  ;;  %vm4127_vm9 = vmand %vm5018_vm5, %vm5017_vm7  ;;  %vm5026_vm5 = vnez %v4939_v25  ;;  %vm5027_vm7 = vnez %v4943_v57  ;;  %v1027_v23 = vsel %vm3891_vm12, %v3749_v16, 0.0 }
 0x2ab   :  { %vm4137_vm4 = vmand %vm5022_vm13, %vm5021_vm1  ;;  %v646_v47 = vsel %vm5026_vm5, %v3749_v16, 0.0  ;;  %v773_v50 = vsel %vm5027_vm7, %v3749_v16, 0.0  ;;  %vm5028_vm1 = vnez %v4947_v53  ;;  %vm5029_vm13 = vcmp.lt.s32.totalorder %v4935_v61, %v2202_v36 }
 0x2ac   :  { %v5024_v17 = vsel %vm4137_vm4, 4294967295, %v5023_v17  ;;  %v900_v22 = vsel %vm5028_vm1, %v3749_v16, 0.0  ;;  %vm5030_vm8 = vcmp.ge.s32.totalorder %v4935_v61, %v2200_v35  ;;  %v5031_v25 = vmov 0 }
 0x2ad   :  { %vm4163_vm14 = vmand %vm5030_vm8, %vm5029_vm13  ;;  %v664_v57 = vmax.f32 %v646_v47, %v661_v62  ;;  %v791_v53 = vmax.f32 %v773_v50, %v788_v24  ;;  %v918_v58 = vmax.f32 %v900_v22, %v915_v51  ;;  %v1045_v3 = vmax.f32 %v1027_v23, %v1042_v56  ;;  %v5057_v56 = vld [vmem:[#allocation26_spill] sm:$0xff] }
 0x2ae   :  { %v5032_v25 = vsel %vm4163_vm14, 4294967295, %v5031_v25  ;;  %vm5033_vm12 = vcmp.lt.s32.totalorder %v4935_v61, %v2214_v38  ;;  %vm5034_vm1 = vcmp.ge.s32.totalorder %v4935_v61, %v2212_v37  ;;  %v5035_v27 = vmov 0 }
 0x2af   :  { %vm4177_vm8 = vmand %vm5034_vm1, %vm5033_vm12  ;;  %vm5037_vm13 = vcmp.lt.s32.totalorder %v4935_v61, %v2218_v40  ;;  %vm5038_vm5 = vcmp.ge.s32.totalorder %v4935_v61, %v2216_v39  ;;  %vm5041_vm14 = vcmp.lt.s32.totalorder %v4935_v61, %v2222_v42  ;;  %vm5042_vm4 = vcmp.ge.s32.totalorder %v4935_v61, %v2220_v41 }
 0x2b0   :  { %v5036_v27 = vsel %vm4177_vm8, 4294967295, %v5035_v27  ;;  %vm4187_vm7 = vmand %vm5038_vm5, %vm5037_vm13  ;;  %v1154_v20 = vsel %vm3913_vm10, %v3749_v16, 0.0  ;;  %v1281_v4 = vsel %vm3939_vm3, %v3749_v16, 0.0  ;;  %v1408_v62 = vsel %vm3957_vm11, %v3749_v16, 0.0 }
 0x2b1   :  { %vm4197_vm12 = vmand %vm5042_vm4, %vm5041_vm14  ;;  %v1535_v24 = vsel %vm3983_vm2, %v3749_v16, 0.0  ;;  %vm5045_vm14 = vcmp.lt.s32.totalorder %v4935_v61, %v2226_v44  ;;  %vm5046_vm4 = vcmp.ge.s32.totalorder %v4935_v61, %v2224_v43  ;;  %v1172_v12 = vmax.f32 %v1154_v20, %v1169_v63 }
 0x2b2   :  { %vm4223_vm5 = vmand %vm5046_vm4, %vm5045_vm14  ;;  %v1299_v55 = vmax.f32 %v1281_v4, %v1296_v7  ;;  %v1426_v5 = vmax.f32 %v1408_v62, %v1423_v60  ;;  %v1553_v16 = vmax.f32 %v1535_v24, %v1550_v6  ;;  %vm5049_vm11 = vcmp.lt.s32.totalorder %v4965_v11, %v2190_v29 }
 0x2b3   :  { %vm5050_vm2 = vcmp.ge.s32.totalorder %v4965_v11, %v2188_v28  ;;  %vm5053_vm14 = vcmp.lt.s32.totalorder %v4965_v11, %v2194_v31  ;;  %vm5054_vm4 = vcmp.ge.s32.totalorder %v4965_v11, %v2192_v30  ;;  %v532_v19 = vmax.f32 %v5057_v56, 0.0 }
 0x2b4   :  { %vm4237_vm13 = vmand %vm5050_vm2, %vm5049_vm11  ;;  %vm5058_vm11 = vcmp.lt.s32.totalorder %v4965_v11, %v2198_v34  ;;  %vm5059_vm2 = vcmp.ge.s32.totalorder %v4965_v11, %v2196_v33  ;;  %v530_v46 = vmax.f32 %v3803_v48, 0.0  ;;  %v4272_v52 = vmax.f32 %v3807_v14, 0.0 }
 0x2b5   :  { %vm4247_vm3 = vmand %vm5054_vm4, %vm5053_vm14  ;;  %v5064_v63 = vmov 0  ;;  %v4285_v7 = vmax.f32 %v3811_v32, 0.0  ;;  %v651_v48 = vsel %vm3997_vm6, %v532_v19, 0.0  ;;  %v778_v14 = vsel %vm4007_vm0, %v532_v19, 0.0 }
 0x2b6   :  { %vm4260_vm1 = vmand %vm5059_vm2, %vm5058_vm11  ;;  %vm5062_vm11 = vcmp.lt.s32.totalorder %v4965_v11, %v2202_v36  ;;  %vm5063_vm2 = vcmp.ge.s32.totalorder %v4965_v11, %v2200_v35  ;;  %vm5068_vm14 = vcmp.lt.s32.totalorder %v4965_v11, %v2214_v38  ;;  %vm5069_vm4 = vcmp.ge.s32.totalorder %v4965_v11, %v2212_v37 }
 0x2b7   :  { %vm4280_vm8 = vmand %vm5063_vm2, %vm5062_vm11  ;;  %vm5066_vm11 = vnez %v4986_v10  ;;  %vm5067_vm2 = vnez %v4993_v9  ;;  %v666_v18 = vmax.f32 %v651_v48, %v664_v57  ;;  %v793_v2 = vmax.f32 %v778_v14, %v791_v53 }
 0x2b8   :  { %v5065_v63 = vsel %vm4280_vm8, 4294967295, %v5064_v63  ;;  %v905_v60 = vsel %vm5066_vm11, %v532_v19, 0.0  ;;  %v1032_v6 = vsel %vm5067_vm2, %v532_v19, 0.0  ;;  %vm4305_vm8 = vmand %vm5069_vm4, %vm5068_vm14  ;;  %vm5072_vm11 = vcmp.lt.s32.totalorder %v4965_v11, %v2218_v40 }
 0x2b9   :  { %v920_v10 = vmax.f32 %v905_v60, %v918_v58  ;;  %v1047_v9 = vmax.f32 %v1032_v6, %v1045_v3  ;;  %vm5073_vm2 = vcmp.ge.s32.totalorder %v4965_v11, %v2216_v39  ;;  %vm5076_vm4 = vnez %v4997_v13 }
 0x2ba   :  { %vm4319_vm14 = vmand %vm5073_vm2, %vm5072_vm11  ;;  %v1159_v50 = vsel %vm5076_vm4, %v532_v19, 0.0  ;;  %v1286_v22 = vsel %vm4067_vm15, %v532_v19, 0.0  ;;  %vm5077_vm6 = vnez %v5005_v26  ;;  %vm5078_vm0 = vnez %v5012_v45 }
 0x2bb   :  { %v1413_v23 = vsel %vm5077_vm6, %v532_v19, 0.0  ;;  %v1540_v57 = vsel %vm5078_vm0, %v532_v19, 0.0  ;;  %vm5079_vm10 = vcmp.lt.s32.totalorder %v4965_v11, %v2222_v42  ;;  %vm5080_vm11 = vcmp.ge.s32.totalorder %v4965_v11, %v2220_v41 }
 0x2bc   :  { %vm4337_vm2 = vmand %vm5080_vm11, %vm5079_vm10  ;;  %v5081_v53 = vmov 0  ;;  %v1174_v13 = vmax.f32 %v1159_v50, %v1172_v12  ;;  %v1301_v58 = vmax.f32 %v1286_v22, %v1299_v55  ;;  %v1428_v1 = vmax.f32 %v1413_v23, %v1426_v5 }
 0x2bd   :  { %v5082_v53 = vsel %vm4337_vm2, 4294967295, %v5081_v53  ;;  %v1555_v3 = vmax.f32 %v1540_v57, %v1553_v16  ;;  %vm5083_vm15 = vcmp.lt.s32.totalorder %v4965_v11, %v2226_v44  ;;  %vm5084_vm6 = vcmp.ge.s32.totalorder %v4965_v11, %v2224_v43  ;;  %v5125_v57 = vld [vmem:[#allocation20_spill] sm:$0xff] }
 0x2be   :  { %vm4347_vm0 = vmand %vm5084_vm6, %vm5083_vm15  ;;  %vm5087_vm4 = vnez %v5016_v59  ;;  %v776_v20 = vsel %vm4127_vm9, %v530_v46, 0.0  ;;  %vm5088_vm10 = vnez %v5024_v17  ;;  %vm5089_vm11 = vnez %v5032_v25 }
 0x2bf   :  { %v649_v45 = vsel %vm5087_vm4, %v530_v46, 0.0  ;;  %v903_v4 = vsel %vm5088_vm10, %v530_v46, 0.0  ;;  %v1030_v62 = vsel %vm5089_vm11, %v530_v46, 0.0  ;;  %vm5090_vm2 = vcmp.lt.s32.totalorder %v5025_v0, %v2190_v29 }
 0x2c0   :  { %vm5091_vm15 = vcmp.ge.s32.totalorder %v5025_v0, %v2188_v28  ;;  %v662_v59 = vmax.f32 %v649_v45, %v666_v18  ;;  %v789_v24 = vmax.f32 %v776_v20, %v793_v2  ;;  %v916_v21 = vmax.f32 %v903_v4, %v920_v10 }
 0x2c1   :  { %vm4365_vm6 = vmand %vm5091_vm15, %vm5090_vm2  ;;  %v1043_v12 = vmax.f32 %v1030_v62, %v1047_v9  ;;  %vm5094_vm9 = vcmp.lt.s32.totalorder %v5025_v0, %v2194_v31  ;;  %vm5095_vm4 = vcmp.ge.s32.totalorder %v5025_v0, %v2192_v30  ;;  %vm5098_vm11 = vnez %v5036_v27 }
 0x2c2   :  { %vm4375_vm10 = vmand %vm5095_vm4, %vm5094_vm9  ;;  %v1157_v28 = vsel %vm5098_vm11, %v530_v46, 0.0  ;;  %v1284_v29 = vsel %vm4187_vm7, %v530_v46, 0.0  ;;  %v1411_v25 = vsel %vm4197_vm12, %v530_v46, 0.0  ;;  %v1538_v55 = vsel %vm4223_vm5, %v530_v46, 0.0 }
 0x2c3   :  { %vm5099_vm2 = vcmp.lt.s32.totalorder %v5025_v0, %v2198_v34  ;;  %vm5100_vm15 = vcmp.ge.s32.totalorder %v5025_v0, %v2196_v33  ;;  %v1170_v31 = vmax.f32 %v1157_v28, %v1174_v13  ;;  %v1297_v27 = vmax.f32 %v1284_v29, %v1301_v58 }
 0x2c4   :  { %vm4393_vm9 = vmand %vm5100_vm15, %vm5099_vm2  ;;  %v1424_v54 = vmax.f32 %v1411_v25, %v1428_v1  ;;  %v1551_v5 = vmax.f32 %v1538_v55, %v1555_v3  ;;  %vm5103_vm7 = vcmp.lt.s32.totalorder %v5025_v0, %v2202_v36  ;;  %vm5104_vm12 = vcmp.ge.s32.totalorder %v5025_v0, %v2200_v35 }
 0x2c5   :  { %vm4403_vm5 = vmand %vm5104_vm12, %vm5103_vm7  ;;  %v652_v33 = vsel %vm4237_vm13, %v4272_v52, 0.0  ;;  %v779_v34 = vsel %vm4247_vm3, %v4272_v52, 0.0  ;;  %v906_v15 = vsel %vm4260_vm1, %v4272_v52, 0.0  ;;  %vm5107_vm4 = vnez %v5065_v63 }
 0x2c6   :  { %v1033_v35 = vsel %vm5107_vm4, %v4272_v52, 0.0  ;;  %vm5108_vm11 = vcmp.lt.s32.totalorder %v5025_v0, %v2214_v38  ;;  %vm5109_vm2 = vcmp.ge.s32.totalorder %v5025_v0, %v2212_v37  ;;  %v665_v16 = vmax.f32 %v652_v33, %v662_v59 }
 0x2c7   :  { %vm4425_vm15 = vmand %vm5109_vm2, %vm5108_vm11  ;;  %v792_v61 = vmax.f32 %v779_v34, %v789_v24  ;;  %v919_v51 = vmax.f32 %v906_v15, %v916_v21  ;;  %v1046_v56 = vmax.f32 %v1033_v35, %v1043_v12  ;;  %vm5112_vm1 = vcmp.lt.s32.totalorder %v5025_v0, %v2218_v40 }
 0x2c8   :  { %vm5113_vm3 = vcmp.ge.s32.totalorder %v5025_v0, %v2216_v39  ;;  %v1160_v37 = vsel %vm4305_vm8, %v4272_v52, 0.0  ;;  %v1287_v38 = vsel %vm4319_vm14, %v4272_v52, 0.0  ;;  %vm5116_vm7 = vnez %v5082_v53 }
 0x2c9   :  { %vm4435_vm13 = vmand %vm5113_vm3, %vm5112_vm1  ;;  %v1414_v8 = vsel %vm5116_vm7, %v4272_v52, 0.0  ;;  %v1541_v39 = vsel %vm4347_vm0, %v4272_v52, 0.0  ;;  %vm5117_vm12 = vcmp.lt.s32.totalorder %v5025_v0, %v2222_v42  ;;  %vm5118_vm4 = vcmp.ge.s32.totalorder %v5025_v0, %v2220_v41 }
 0x2ca   :  { %vm4457_vm11 = vmand %vm5118_vm4, %vm5117_vm12  ;;  %v1173_v46 = vmax.f32 %v1160_v37, %v1170_v31  ;;  %v1300_v63 = vmax.f32 %v1287_v38, %v1297_v27  ;;  %v1427_v48 = vmax.f32 %v1414_v8, %v1424_v54  ;;  %v1554_v14 = vmax.f32 %v1541_v39, %v1551_v5 }
 0x2cb   :  { %vm5121_vm8 = vcmp.lt.s32.totalorder %v5025_v0, %v2226_v44  ;;  %vm5122_vm14 = vcmp.ge.s32.totalorder %v5025_v0, %v2224_v43  ;;  %v650_v41 = vsel %vm4365_vm6, %v4285_v7, 0.0  ;;  %v777_v42 = vsel %vm4375_vm10, %v4285_v7, 0.0 }
 0x2cc   :  { %vm4467_vm0 = vmand %vm5122_vm14, %vm5121_vm8  ;;  %v904_v60 = vsel %vm4393_vm9, %v4285_v7, 0.0  ;;  %v1031_v43 = vsel %vm4403_vm5, %v4285_v7, 0.0  ;;  %v667_v44 = vmax.f32 %v665_v16, %v650_v41  ;;  %v794_v0 = vmax.f32 %v792_v61, %v777_v42 }
 0x2cd   :  { %v921_v6 = vmax.f32 %v919_v51, %v904_v60  ;;  %v1048_v32 = vmax.f32 %v1046_v56, %v1031_v43  ;;  %v1158_v18 = vsel %vm4425_vm15, %v4285_v7, 0.0  ;;  %v1285_v2 = vsel %vm4435_vm13, %v4285_v7, 0.0 }
 0x2ce   :  { %v1412_v10 = vsel %vm4457_vm11, %v4285_v7, 0.0  ;;  %v1539_v9 = vsel %vm4467_vm0, %v4285_v7, 0.0  ;;  %v668_v47 = vrot.slane %v667_v44, 4  ;;  %v795_v50 = vrot.slane %v794_v0, 4 }
 0x2cf   :  { %v922_v22 = vrot.slane %v921_v6, 4  ;;  %v1049_v23 = vrot.slane %v1048_v32, 4  ;;  %vm674_vm6 = vcmp.eq.s32.totalorder %v5125_v57, 0  ;;  %v1175_v53 = vmax.f32 %v1173_v46, %v1158_v18 }
 0x2d0   :  { %v1302_v13 = vmax.f32 %v1300_v63, %v1285_v2  ;;  %v1429_v58 = vmax.f32 %v1427_v48, %v1412_v10  ;;  %v1556_v1 = vmax.f32 %v1554_v14, %v1539_v9  ;;  %v669_v3 = vmax.f32 %v667_v44, %v668_v47 }
 0x2d1   :  { %v796_v26 = vmax.f32 %v794_v0, %v795_v50  ;;  %v923_v45 = vmax.f32 %v921_v6, %v922_v22  ;;  %v1050_v20 = vmax.f32 %v1048_v32, %v1049_v23  ;;  %v1176_v4 = vrot.slane %v1175_v53, 4  ;;  %v1569_v32 = vld [vmem:[%s1568_s29] sm:$0xff] }
 0x2d2   :  { %v1303_v62 = vrot.slane %v1302_v13, 4  ;;  %v1430_v11 = vrot.slane %v1429_v58, 4  ;;  %v1557_v59 = vrot.slane %v1556_v1, 4  ;;  %v670_v24 = vrot.slane %v669_v3, 2 }
 0x2d3   :  { %v797_v7 = vrot.slane %v796_v26, 2  ;;  %v924_v21 = vrot.slane %v923_v45, 2  ;;  %v1051_v12 = vrot.slane %v1050_v20, 2  ;;  %v1177_v17 = vmax.f32 %v1175_v53, %v1176_v4 }
 0x2d4   :  { %v1304_v28 = vmax.f32 %v1302_v13, %v1303_v62  ;;  %v1431_v29 = vmax.f32 %v1429_v58, %v1430_v11  ;;  %v1558_v25 = vmax.f32 %v1556_v1, %v1557_v59  ;;  %v671_v55 = vmax.f32 %v669_v3, %v670_v24 }
 0x2d5   :  { %v798_v30 = vmax.f32 %v796_v26, %v797_v7  ;;  %v925_v31 = vmax.f32 %v923_v45, %v924_v21  ;;  %v1052_v27 = vmax.f32 %v1050_v20, %v1051_v12  ;;  %v1178_v54 = vrot.slane %v1177_v17, 2 }
 0x2d6   :  { %v1305_v5 = vrot.slane %v1304_v28, 2  ;;  %v1432_v49 = vrot.slane %v1431_v29, 2  ;;  %v1559_v33 = vrot.slane %v1558_v25, 2  ;;  %v672_v34 = vrot.slane %v671_v55, 1 }
 0x2d7   :  { %v799_v15 = vrot.slane %v798_v30, 1  ;;  %v926_v35 = vrot.slane %v925_v31, 1  ;;  %v1053_v36 = vrot.slane %v1052_v27, 1  ;;  %v1179_v16 = vmax.f32 %v1177_v17, %v1178_v54 }
 0x2d8   :  { %v1306_v61 = vmax.f32 %v1304_v28, %v1305_v5  ;;  %v1433_v51 = vmax.f32 %v1431_v29, %v1432_v49  ;;  %v1560_v56 = vmax.f32 %v1558_v25, %v1559_v33  ;;  %v673_v19 = vmax.f32 %v671_v55, %v672_v34 }
 0x2d9   :  { %v800_v37 = vmax.f32 %v798_v30, %v799_v15  ;;  %vm801_vm10 = vcmp.eq.s32.totalorder %v5125_v57, 1  ;;  %vm928_vm9 = vcmp.eq.s32.totalorder %v5125_v57, 2  ;;  %v1180_v38 = vrot.slane %v1179_v16, 1 }
 0x2da   :  { %v1307_v8 = vrot.slane %v1306_v61, 1  ;;  %v677_v39 = vsel %vm674_vm6, %v673_v19, 0.0  ;;  %v927_v40 = vmax.f32 %v925_v31, %v926_v35  ;;  %vm1055_vm5 = vcmp.eq.s32.totalorder %v5125_v57, 3 }
 0x2db   :  { %v1434_v46 = vrot.slane %v1433_v51, 1  ;;  %v804_v63 = vsel %vm801_vm10, %v800_v37, %v677_v39  ;;  %v1054_v48 = vmax.f32 %v1052_v27, %v1053_v36  ;;  %vm1182_vm2 = vcmp.eq.s32.totalorder %v5125_v57, 4 }
 0x2dc   :  { %v1561_v14 = vrot.slane %v1560_v56, 1  ;;  %v931_v52 = vsel %vm928_vm9, %v927_v40, %v804_v63  ;;  %v1181_v41 = vmax.f32 %v1179_v16, %v1180_v38  ;;  %vm1309_vm15 = vcmp.eq.s32.totalorder %v5125_v57, 5 }
 0x2dd   :  { %v1058_v42 = vsel %vm1055_vm5, %v1054_v48, %v931_v52  ;;  %v1308_v60 = vmax.f32 %v1306_v61, %v1307_v8  ;;  %vm1436_vm1 = vcmp.eq.s32.totalorder %v5125_v57, 6  ;;  %v1435_v44 = vmax.f32 %v1433_v51, %v1434_v46 }
 0x2de   :  { %v1185_v43 = vsel %vm1182_vm2, %v1181_v41, %v1058_v42  ;;  %vm1563_vm3 = vcmp.eq.s32.totalorder %v5125_v57, 7  ;;  %v1562_v6 = vmax.f32 %v1560_v56, %v1561_v14 }
 0x2df   :  { %v1312_v0 = vsel %vm1309_vm15, %v1308_v60, %v1185_v43 }
 0x2e0   :  { %v1439_v18 = vsel %vm1436_vm1, %v1435_v44, %v1312_v0 }
 0x2e1   :  { %v1566_v2 = vsel %vm1563_vm3, %v1562_v6, %v1439_v18 }
 0x2e2   :  { %v1570_v10 = vmax.f32 %v1569_v32, %v1566_v2 }
 0x2e4   :  { %1571 = vst [vmem:[%s1568_s29] sm:$0xff] %v1570_v10 }
 0x2eb   :  { %v1575_v9 = vld [vmem:[#allocation2] sm:$0xff] }
 0x2ec   :  { %v1576_v47 = vpack.c.bf16 %v1575_v9, %v1575_v9 }
 0x2ee   :  { %1871 = vmatmul.mubr.bf16.vlgmr.msra.gmra.mrb[16].mxu0 %v1576_v47 }
 0x3c1   :  { %v1675_v50 = vpop.f32.mrb[16].mxu0 }
 0x3c2   :  { %1681 = vst [vmem:[#allocation14] sm:$0xff] %v1675_v50  ;;  %v1872_v22 = vpop.f32.mrb[17].mxu0 }
 0x3c3   :  { %v1678_v23 = vpop.f32.mrb[18].mxu0 }
 0x3c4   :  { %2027 = shalt.err (!%p2024_p13)
}
 0x3c5   :  { %s2028_s5 = scalar_lea.hbm %s4528_s8, 128 }
 0x3c6   :  { %p2029_p0 = scmp.ne.s32.totalorder %s4528_s8, %s2028_s5  ;;  %p2032_p1 = scmp.lt.u32.totalorder %s2028_s5, %s4528_s8 }
 0x3c8   :  { %p2034_p2 = pnand %p2032_p1, %p2029_p0 }
 0x3ca   :  { %2037 = shalt.err (!%p2034_p2)
}
 0x3cb   :  { %1691 = dma.vmem_to_hbm [thread:$0]  %s1689_s9, 128, %s4528_s8, [#allocation8]   ;;  %v1873_v57 = vpop.f32.mrb[19].mxu0 }
 0x3cc   :  { %2046 = dma.done.wait [#allocation8], 128  }
 0x3cd   :  { %2047 = vsyncadd [#allocation8], 4294967168 }
 0x3ce   :  { %1695 = vsyncpa [#allocation7], 1 }
 0x3cf   :  { %1696 = vsyncpa [#allocation10], 1 }
 0x3d0   :  { %1697 = vsyncpa [#allocation13], 1 }
 0x3d1   :  { %1698 = vsyncpa [#allocation8], 1 }

</bundles_post_ra>
